<compile_context>
chip_gen: v6e
topology: v6e:2x2x1
jax: 0.10.0
libtpu: 0.0.40
codegen_flags: <defaults>
</compile_context>

<pallas_src>
import math

import jax
import jax.numpy as jnp
import numpy as np
from jax.experimental import pallas as pl
from jax.experimental.pallas import tpu as pltpu

B, S, D = 2, 8, 32          # batch, seq, d_model
H = 4                       # attention heads
DK = D // H                 # per-head dim
DFF = 64                    # FFN hidden dim
N_LAYERS = 2                # number of cloned encoder layers
EPS = 1e-6                  # LayerNorm eps
VEC_W = 128                 # lane-padded width of the packed bias/LN table

# rows of the packed per-layer vector table
R_LN1G, R_LN1B, R_BQKV, R_BO, R_LN2G, R_LN2B, R_B1, R_B2 = range(8)


def _layer_norm(x, g, b):
    mu = jnp.mean(x, axis=-1, keepdims=True)
    var = jnp.mean((x - mu) ** 2, axis=-1, keepdims=True)
    return (x - mu) * jax.lax.rsqrt(var + EPS) * g + b


def encoder_kernel(x_ref, neg_ref, wqkv_ref, wo3_ref, w1_ref, w2_ref, vec_ref,
                   o_ref):
    x = x_ref[...]                 # [B*S, D]  (batch folded into rows)
    neg = neg_ref[...]             # [B, S]    additive mask bias ((m-1)*1e9)

    for l in range(N_LAYERS):      # static unrolled layer loop; x stays resident
        wqkv = wqkv_ref[l]         # [D, 3D]   (1/sqrt(DK) folded into Wq cols)
        wo3 = wo3_ref[l]           # [H, DK, D]
        w1 = w1_ref[l]             # [D, DFF]
        w2 = w2_ref[l]             # [DFF, D]
        vec = vec_ref[l]           # [8, VEC_W] packed LN params + biases

        ln1_g = vec[R_LN1G:R_LN1G + 1, :D]
        ln1_b = vec[R_LN1B:R_LN1B + 1, :D]
        bqkv = vec[R_BQKV:R_BQKV + 1, :3 * D]
        bo = vec[R_BO:R_BO + 1, :D]
        ln2_g = vec[R_LN2G:R_LN2G + 1, :D]
        ln2_b = vec[R_LN2B:R_LN2B + 1, :D]
        b1 = vec[R_B1:R_B1 + 1, :DFF]
        b2 = vec[R_B2:R_B2 + 1, :D]

        # ---- sublayer 1: pre-LN fused-QKV multi-head attention + residual ----
        xn = _layer_norm(x, ln1_g, ln1_b)
        qkv = jnp.dot(xn, wqkv, preferred_element_type=jnp.float32) + bqkv
        q = qkv[:, 0 * D:1 * D]
        k = qkv[:, 1 * D:2 * D]
        v = qkv[:, 2 * D:3 * D]

        # head-major stacks [H, B*S, DK]
        qh = jnp.stack([q[:, h * DK:(h + 1) * DK] for h in range(H)])
        kh = jnp.stack([k[:, h * DK:(h + 1) * DK] for h in range(H)])
        vh = jnp.stack([v[:, h * DK:(h + 1) * DK] for h in range(H)])

        ctx = []
        for b in range(B):                        # static; no cross-batch mixing
            r0, r1 = b * S, (b + 1) * S
            qb = qh[:, r0:r1, :]                  # [H, S, DK]
            kb = kh[:, r0:r1, :]
            vb = vh[:, r0:r1, :]
            s = jnp.einsum('hqd,hkd->hqk', qb, kb,
                           preferred_element_type=jnp.float32)   # [H, S, S]
            s = s + neg[b:b + 1, :][None]         # additive mask over key axis
            s = s - jnp.max(s, axis=-1, keepdims=True)
            p = jnp.exp(s)
            p = p / jnp.sum(p, axis=-1, keepdims=True)
            ctx.append(jnp.einsum('hqk,hkd->hqd', p, vb,
                                  preferred_element_type=jnp.float32))
        ctx_all = jnp.concatenate(ctx, axis=1)    # [H, B*S, DK]

        # per-head output projection; summing over heads replaces lane-concat
        proj = jnp.einsum('hnd,hde->hne', ctx_all, wo3,
                          preferred_element_type=jnp.float32)    # [H, B*S, D]
        x = x + jnp.sum(proj, axis=0) + bo

        # ---- sublayer 2: pre-LN position-wise FFN + residual ----
        xn2 = _layer_norm(x, ln2_g, ln2_b)
        hdn = jnp.maximum(
            jnp.dot(xn2, w1, preferred_element_type=jnp.float32) + b1, 0.0)
        x = x + jnp.dot(hdn, w2, preferred_element_type=jnp.float32) + b2

    # TODO(synk): at larger D, present a lane-dense (multiple-of-128) output view.
    o_ref[...] = x


def pack_params(layer_params):
    """Pack per-layer params into 5 stacked arrays (leading N_LAYERS axis)."""
    assert VEC_W >= 3 * D and VEC_W >= DFF and VEC_W >= D
    scale = 1.0 / math.sqrt(DK)
    wqkv_l, wo3_l, w1_l, w2_l, vec_l = [], [], [], [], []

    def row(vv):
        return jnp.pad(vv, (0, VEC_W - vv.shape[0]))

    for p in layer_params:
        wqkv_l.append(jnp.concatenate([p['wq'] * scale, p['wk'], p['wv']], axis=1))
        wo3_l.append(p['wo'].reshape(H, DK, D))
        w1_l.append(p['w1'])
        w2_l.append(p['w2'])
        bqkv = jnp.concatenate([p['bq'][0] * scale, p['bk'][0], p['bv'][0]])
        vec_l.append(jnp.stack([
            row(p['ln1_g'][0]), row(p['ln1_b'][0]), row(bqkv), row(p['bo'][0]),
            row(p['ln2_g'][0]), row(p['ln2_b'][0]), row(p['b1'][0]),
            row(p['b2'][0])]))
    return dict(wqkv=jnp.stack(wqkv_l),   # [N, D, 3D]
                wo3=jnp.stack(wo3_l),     # [N, H, DK, D]
                w1=jnp.stack(w1_l),       # [N, D, DFF]
                w2=jnp.stack(w2_l),       # [N, DFF, D]
                vec=jnp.stack(vec_l))     # [N, 8, VEC_W]


@jax.jit
def encoder_forward(x, mask, packed):
    x2 = x.reshape(B * S, D)
    neg = (mask[:, 0, :].astype(jnp.float32) - 1.0) * 1e9     # [B, S]
    vmem = pl.BlockSpec(memory_space=pltpu.MemorySpace.VMEM)
    out = pl.pallas_call(
        encoder_kernel,
        out_shape=jax.ShapeDtypeStruct((B * S, D), jnp.float32),
        in_specs=[vmem] * 7,
        out_specs=vmem,
    )(x2, neg, packed['wqkv'], packed['wo3'], packed['w1'], packed['w2'],
      packed['vec'])
    return out.reshape(B, S, D)


# ---------------- pure-JAX reference (for correctness check) ----------------
def _layer_ref(x, mask, p):
    def ln(t, g, b):
        mu = t.mean(-1, keepdims=True)
        var = ((t - mu) ** 2).mean(-1, keepdims=True)
        return (t - mu) / jnp.sqrt(var + EPS) * g + b

    m = mask[:, 0, :]                                  # [B, S]
    xn = ln(x, p['ln1_g'][0], p['ln1_b'][0])
    q = xn @ p['wq'] + p['bq'][0]
    k = xn @ p['wk'] + p['bk'][0]
    v = xn @ p['wv'] + p['bv'][0]
    qh = q.reshape(B, S, H, DK).transpose(0, 2, 1, 3)  # [B, H, S, DK]
    kh = k.reshape(B, S, H, DK).transpose(0, 2, 1, 3)
    vh = v.reshape(B, S, H, DK).transpose(0, 2, 1, 3)
    s = jnp.einsum('bhqd,bhkd->bhqk', qh, kh) / jnp.sqrt(jnp.float32(DK))
    s = jnp.where(m[:, None, None, :] == 0.0, -1e9, s)
    p_attn = jax.nn.softmax(s, axis=-1)
    o = jnp.einsum('bhqk,bhkd->bhqd', p_attn, vh)
    o = o.transpose(0, 2, 1, 3).reshape(B, S, D)
    x = x + (o @ p['wo'] + p['bo'][0])

    xn2 = ln(x, p['ln2_g'][0], p['ln2_b'][0])
    hdn = jnp.maximum(xn2 @ p['w1'] + p['b1'][0], 0.0)
    return x + (hdn @ p['w2'] + p['b2'][0])


def init_layer_params(key):
    ks = jax.random.split(key, 6)
    sc = 0.1
    f32 = jnp.float32
    return dict(
        ln1_g=jnp.ones((1, D), f32), ln1_b=jnp.zeros((1, D), f32),
        wq=sc * jax.random.normal(ks[0], (D, D), f32), bq=jnp.zeros((1, D), f32),
        wk=sc * jax.random.normal(ks[1], (D, D), f32), bk=jnp.zeros((1, D), f32),
        wv=sc * jax.random.normal(ks[2], (D, D), f32), bv=jnp.zeros((1, D), f32),
        wo=sc * jax.random.normal(ks[3], (D, D), f32), bo=jnp.zeros((1, D), f32),
        ln2_g=jnp.ones((1, D), f32), ln2_b=jnp.zeros((1, D), f32),
        w1=sc * jax.random.normal(ks[4], (D, DFF), f32), b1=jnp.zeros((1, DFF), f32),
        w2=sc * jax.random.normal(ks[5], (DFF, D), f32), b2=jnp.zeros((1, D), f32),
    )


if __name__ == "__main__":
    key = jax.random.PRNGKey(0)
    kx, *lkeys = jax.random.split(key, 1 + N_LAYERS)
    x = jax.random.normal(kx, (B, S, D), jnp.float32)
    # mask: batch 0 attends everywhere; batch 1 masks out the last 3 key positions
    mask = jnp.ones((B, 1, S), jnp.float32).at[1, 0, S - 3:].set(0.0)

    layer_params = [init_layer_params(k) for k in lkeys]
    packed = pack_params(layer_params)

    out = jax.block_until_ready(encoder_forward(x, mask, packed))

    ref = x
    for p in layer_params:
        ref = _layer_ref(ref, mask, p)

    assert out.shape == (B, S, D)
    np.testing.assert_allclose(np.asarray(out), np.asarray(ref), atol=1e-4, rtol=1e-4)
    print("KERNEL_OK")
</pallas_src>

<mosaic_0001>
module attributes {stable_mosaic.version = 11 : i64} {
  func.func @encoder_kernel(%arg0: memref<16x32xf32, #tpu.memory_space<vmem>>, %arg1: memref<2x8xf32, #tpu.memory_space<vmem>>, %arg2: memref<2x32x96xf32, #tpu.memory_space<vmem>>, %arg3: memref<2x4x8x32xf32, #tpu.memory_space<vmem>>, %arg4: memref<2x32x64xf32, #tpu.memory_space<vmem>>, %arg5: memref<2x64x32xf32, #tpu.memory_space<vmem>>, %arg6: memref<2x8x128xf32, #tpu.memory_space<vmem>>, %arg7: memref<16x32xf32, #tpu.memory_space<vmem>>) attributes {dimension_semantics = [], scalar_prefetch = 0 : i64, scratch_operands = 0 : i64, tpu.core_type = #tpu.core_type<tc>} {
    %c0 = arith.constant 0 : index
    %c0_0 = arith.constant 0 : index
    %0 = vector.load %arg0[%c0, %c0_0] : memref<16x32xf32, #tpu.memory_space<vmem>>, vector<16x32xf32>
    %c0_1 = arith.constant 0 : index
    %c0_2 = arith.constant 0 : index
    %1 = vector.load %arg1[%c0_1, %c0_2] : memref<2x8xf32, #tpu.memory_space<vmem>>, vector<2x8xf32>
    %c0_3 = arith.constant 0 : index
    %c0_4 = arith.constant 0 : index
    %c0_5 = arith.constant 0 : index
    %2 = vector.load %arg2[%c0_3, %c0_4, %c0_5] : memref<2x32x96xf32, #tpu.memory_space<vmem>>, vector<1x32x96xf32>
    %3 = vector.shape_cast %2 : vector<1x32x96xf32> to vector<32x96xf32>
    %c0_6 = arith.constant 0 : index
    %c0_7 = arith.constant 0 : index
    %c0_8 = arith.constant 0 : index
    %c0_9 = arith.constant 0 : index
    %4 = vector.load %arg3[%c0_6, %c0_7, %c0_8, %c0_9] : memref<2x4x8x32xf32, #tpu.memory_space<vmem>>, vector<1x4x8x32xf32>
    %5 = vector.shape_cast %4 : vector<1x4x8x32xf32> to vector<4x8x32xf32>
    %c0_10 = arith.constant 0 : index
    %c0_11 = arith.constant 0 : index
    %c0_12 = arith.constant 0 : index
    %6 = vector.load %arg4[%c0_10, %c0_11, %c0_12] : memref<2x32x64xf32, #tpu.memory_space<vmem>>, vector<1x32x64xf32>
    %7 = vector.shape_cast %6 : vector<1x32x64xf32> to vector<32x64xf32>
    %c0_13 = arith.constant 0 : index
    %c0_14 = arith.constant 0 : index
    %c0_15 = arith.constant 0 : index
    %8 = vector.load %arg5[%c0_13, %c0_14, %c0_15] : memref<2x64x32xf32, #tpu.memory_space<vmem>>, vector<1x64x32xf32>
    %9 = vector.shape_cast %8 : vector<1x64x32xf32> to vector<64x32xf32>
    %c0_16 = arith.constant 0 : index
    %c0_17 = arith.constant 0 : index
    %c0_18 = arith.constant 0 : index
    %10 = vector.load %arg6[%c0_16, %c0_17, %c0_18] : memref<2x8x128xf32, #tpu.memory_space<vmem>>, vector<1x8x128xf32>
    %11 = vector.shape_cast %10 : vector<1x8x128xf32> to vector<8x128xf32>
    %12 = vector.extract_strided_slice %11 {offsets = [0, 0], sizes = [1, 32], strides = [1, 1]} : vector<8x128xf32> to vector<1x32xf32>
    %13 = vector.extract_strided_slice %11 {offsets = [1, 0], sizes = [1, 32], strides = [1, 1]} : vector<8x128xf32> to vector<1x32xf32>
    %14 = vector.extract_strided_slice %11 {offsets = [2, 0], sizes = [1, 96], strides = [1, 1]} : vector<8x128xf32> to vector<1x96xf32>
    %15 = vector.extract_strided_slice %11 {offsets = [3, 0], sizes = [1, 32], strides = [1, 1]} : vector<8x128xf32> to vector<1x32xf32>
    %16 = vector.extract_strided_slice %11 {offsets = [4, 0], sizes = [1, 32], strides = [1, 1]} : vector<8x128xf32> to vector<1x32xf32>
    %17 = vector.extract_strided_slice %11 {offsets = [5, 0], sizes = [1, 32], strides = [1, 1]} : vector<8x128xf32> to vector<1x32xf32>
    %18 = vector.extract_strided_slice %11 {offsets = [6, 0], sizes = [1, 64], strides = [1, 1]} : vector<8x128xf32> to vector<1x64xf32>
    %19 = vector.extract_strided_slice %11 {offsets = [7, 0], sizes = [1, 32], strides = [1, 1]} : vector<8x128xf32> to vector<1x32xf32>
    %cst = arith.constant dense<0.000000e+00> : vector<16xf32>
    %20 = vector.multi_reduction <add>, %0, %cst [1] : vector<16x32xf32> to vector<16xf32>
    %21 = vector.shape_cast %20 : vector<16xf32> to vector<16x1xf32>
    %cst_19 = arith.constant 3.200000e+01 : f32
    %22 = vector.broadcast %cst_19 : f32 to vector<16x1xf32>
    %23 = arith.divf %21, %22 : vector<16x1xf32>
    %24 = vector.broadcast %23 : vector<16x1xf32> to vector<16x32xf32>
    %25 = arith.subf %0, %24 : vector<16x32xf32>
    %26 = arith.mulf %25, %25 : vector<16x32xf32>
    %cst_20 = arith.constant dense<0.000000e+00> : vector<16xf32>
    %27 = vector.multi_reduction <add>, %26, %cst_20 [1] : vector<16x32xf32> to vector<16xf32>
    %28 = vector.shape_cast %27 : vector<16xf32> to vector<16x1xf32>
    %cst_21 = arith.constant 3.200000e+01 : f32
    %29 = vector.broadcast %cst_21 : f32 to vector<16x1xf32>
    %30 = arith.divf %28, %29 : vector<16x1xf32>
    %31 = vector.broadcast %23 : vector<16x1xf32> to vector<16x32xf32>
    %32 = arith.subf %0, %31 : vector<16x32xf32>
    %cst_22 = arith.constant 9.99999997E-7 : f32
    %33 = vector.broadcast %cst_22 : f32 to vector<16x1xf32>
    %34 = arith.addf %30, %33 : vector<16x1xf32>
    %35 = math.rsqrt %34 : vector<16x1xf32>
    %36 = vector.broadcast %35 : vector<16x1xf32> to vector<16x32xf32>
    %37 = arith.mulf %32, %36 : vector<16x32xf32>
    %38 = vector.broadcast %12 : vector<1x32xf32> to vector<16x32xf32>
    %39 = arith.mulf %37, %38 : vector<16x32xf32>
    %40 = vector.broadcast %13 : vector<1x32xf32> to vector<16x32xf32>
    %41 = arith.addf %39, %40 : vector<16x32xf32>
    %cst_23 = arith.constant dense<0.000000e+00> : vector<16x96xf32>
    %42 = tpu.matmul %41, %3, %cst_23 {dimension_numbers = #tpu.dot_dimension_numbers<[1], [0], [0], [1], [0, 0, 1, 1], [], []>} : vector<16x32xf32>, vector<32x96xf32>, vector<16x96xf32> -> vector<16x96xf32>
    %43 = vector.broadcast %14 : vector<1x96xf32> to vector<16x96xf32>
    %44 = arith.addf %42, %43 : vector<16x96xf32>
    %45 = vector.extract_strided_slice %44 {offsets = [0, 0], sizes = [16, 32], strides = [1, 1]} : vector<16x96xf32> to vector<16x32xf32>
    %46 = vector.extract_strided_slice %44 {offsets = [0, 32], sizes = [16, 32], strides = [1, 1]} : vector<16x96xf32> to vector<16x32xf32>
    %47 = vector.extract_strided_slice %44 {offsets = [0, 64], sizes = [16, 32], strides = [1, 1]} : vector<16x96xf32> to vector<16x32xf32>
    %48 = vector.extract_strided_slice %45 {offsets = [0, 0], sizes = [16, 8], strides = [1, 1]} : vector<16x32xf32> to vector<16x8xf32>
    %49 = vector.extract_strided_slice %45 {offsets = [0, 8], sizes = [16, 8], strides = [1, 1]} : vector<16x32xf32> to vector<16x8xf32>
    %50 = vector.extract_strided_slice %45 {offsets = [0, 16], sizes = [16, 8], strides = [1, 1]} : vector<16x32xf32> to vector<16x8xf32>
    %51 = vector.extract_strided_slice %45 {offsets = [0, 24], sizes = [16, 8], strides = [1, 1]} : vector<16x32xf32> to vector<16x8xf32>
    %52 = vector.shape_cast %48 : vector<16x8xf32> to vector<1x16x8xf32>
    %53 = vector.shape_cast %49 : vector<16x8xf32> to vector<1x16x8xf32>
    %54 = vector.shape_cast %50 : vector<16x8xf32> to vector<1x16x8xf32>
    %55 = vector.shape_cast %51 : vector<16x8xf32> to vector<1x16x8xf32>
    %56 = tpu.concatenate %52, %53, %54, %55 in 0 : vector<1x16x8xf32>, vector<1x16x8xf32>, vector<1x16x8xf32>, vector<1x16x8xf32> -> vector<4x16x8xf32>
    %57 = vector.extract_strided_slice %46 {offsets = [0, 0], sizes = [16, 8], strides = [1, 1]} : vector<16x32xf32> to vector<16x8xf32>
    %58 = vector.extract_strided_slice %46 {offsets = [0, 8], sizes = [16, 8], strides = [1, 1]} : vector<16x32xf32> to vector<16x8xf32>
    %59 = vector.extract_strided_slice %46 {offsets = [0, 16], sizes = [16, 8], strides = [1, 1]} : vector<16x32xf32> to vector<16x8xf32>
    %60 = vector.extract_strided_slice %46 {offsets = [0, 24], sizes = [16, 8], strides = [1, 1]} : vector<16x32xf32> to vector<16x8xf32>
    %61 = vector.shape_cast %57 : vector<16x8xf32> to vector<1x16x8xf32>
    %62 = vector.shape_cast %58 : vector<16x8xf32> to vector<1x16x8xf32>
    %63 = vector.shape_cast %59 : vector<16x8xf32> to vector<1x16x8xf32>
    %64 = vector.shape_cast %60 : vector<16x8xf32> to vector<1x16x8xf32>
    %65 = tpu.concatenate %61, %62, %63, %64 in 0 : vector<1x16x8xf32>, vector<1x16x8xf32>, vector<1x16x8xf32>, vector<1x16x8xf32> -> vector<4x16x8xf32>
    %66 = vector.extract_strided_slice %47 {offsets = [0, 0], sizes = [16, 8], strides = [1, 1]} : vector<16x32xf32> to vector<16x8xf32>
    %67 = vector.extract_strided_slice %47 {offsets = [0, 8], sizes = [16, 8], strides = [1, 1]} : vector<16x32xf32> to vector<16x8xf32>
    %68 = vector.extract_strided_slice %47 {offsets = [0, 16], sizes = [16, 8], strides = [1, 1]} : vector<16x32xf32> to vector<16x8xf32>
    %69 = vector.extract_strided_slice %47 {offsets = [0, 24], sizes = [16, 8], strides = [1, 1]} : vector<16x32xf32> to vector<16x8xf32>
    %70 = vector.shape_cast %66 : vector<16x8xf32> to vector<1x16x8xf32>
    %71 = vector.shape_cast %67 : vector<16x8xf32> to vector<1x16x8xf32>
    %72 = vector.shape_cast %68 : vector<16x8xf32> to vector<1x16x8xf32>
    %73 = vector.shape_cast %69 : vector<16x8xf32> to vector<1x16x8xf32>
    %74 = tpu.concatenate %70, %71, %72, %73 in 0 : vector<1x16x8xf32>, vector<1x16x8xf32>, vector<1x16x8xf32>, vector<1x16x8xf32> -> vector<4x16x8xf32>
    %75 = vector.extract_strided_slice %56 {offsets = [0, 0, 0], sizes = [4, 8, 8], strides = [1, 1, 1]} : vector<4x16x8xf32> to vector<4x8x8xf32>
    %76 = vector.extract_strided_slice %65 {offsets = [0, 0, 0], sizes = [4, 8, 8], strides = [1, 1, 1]} : vector<4x16x8xf32> to vector<4x8x8xf32>
    %77 = vector.extract_strided_slice %74 {offsets = [0, 0, 0], sizes = [4, 8, 8], strides = [1, 1, 1]} : vector<4x16x8xf32> to vector<4x8x8xf32>
    "tpu.trace_start"() <{level = 10 : i32, message = "hqd,hkd->hqk"}> : () -> ()
    %cst_24 = arith.constant dense<0.000000e+00> : vector<4x8x8xf32>
    %78 = tpu.matmul %75, %76, %cst_24 {dimension_numbers = #tpu.dot_dimension_numbers<[2], [2], [1], [1], [0, 0, 0, 1, 1, 1], [0], [0]>} : vector<4x8x8xf32>, vector<4x8x8xf32>, vector<4x8x8xf32> -> vector<4x8x8xf32>
    "tpu.trace_stop"() : () -> ()
    %79 = vector.extract_strided_slice %1 {offsets = [0, 0], sizes = [1, 8], strides = [1, 1]} : vector<2x8xf32> to vector<1x8xf32>
    %80 = vector.shape_cast %79 : vector<1x8xf32> to vector<1x1x8xf32>
    %81 = vector.broadcast %80 : vector<1x1x8xf32> to vector<4x8x8xf32>
    %82 = arith.addf %78, %81 : vector<4x8x8xf32>
    %cst_25 = arith.constant dense<0xFF800000> : vector<4x8xf32>
    %83 = vector.multi_reduction <maximumf>, %82, %cst_25 [2] : vector<4x8x8xf32> to vector<4x8xf32>
    %84 = vector.shape_cast %83 : vector<4x8xf32> to vector<4x8x1xf32>
    %85 = vector.broadcast %84 : vector<4x8x1xf32> to vector<4x8x8xf32>
    %86 = arith.subf %82, %85 : vector<4x8x8xf32>
    %87 = math.exp %86 : vector<4x8x8xf32>
    %cst_26 = arith.constant dense<0.000000e+00> : vector<4x8xf32>
    %88 = vector.multi_reduction <add>, %87, %cst_26 [2] : vector<4x8x8xf32> to vector<4x8xf32>
    %89 = vector.shape_cast %88 : vector<4x8xf32> to vector<4x8x1xf32>
    %90 = vector.broadcast %89 : vector<4x8x1xf32> to vector<4x8x8xf32>
    %91 = arith.divf %87, %90 : vector<4x8x8xf32>
    "tpu.trace_start"() <{level = 10 : i32, message = "hqk,hkd->hqd"}> : () -> ()
    %cst_27 = arith.constant dense<0.000000e+00> : vector<4x8x8xf32>
    %92 = tpu.matmul %91, %77, %cst_27 {dimension_numbers = #tpu.dot_dimension_numbers<[2], [1], [1], [2], [0, 0, 0, 1, 1, 2], [0], [0]>} : vector<4x8x8xf32>, vector<4x8x8xf32>, vector<4x8x8xf32> -> vector<4x8x8xf32>
    "tpu.trace_stop"() : () -> ()
    %93 = vector.extract_strided_slice %56 {offsets = [0, 8, 0], sizes = [4, 8, 8], strides = [1, 1, 1]} : vector<4x16x8xf32> to vector<4x8x8xf32>
    %94 = vector.extract_strided_slice %65 {offsets = [0, 8, 0], sizes = [4, 8, 8], strides = [1, 1, 1]} : vector<4x16x8xf32> to vector<4x8x8xf32>
    %95 = vector.extract_strided_slice %74 {offsets = [0, 8, 0], sizes = [4, 8, 8], strides = [1, 1, 1]} : vector<4x16x8xf32> to vector<4x8x8xf32>
    "tpu.trace_start"() <{level = 10 : i32, message = "hqd,hkd->hqk"}> : () -> ()
    %cst_28 = arith.constant dense<0.000000e+00> : vector<4x8x8xf32>
    %96 = tpu.matmul %93, %94, %cst_28 {dimension_numbers = #tpu.dot_dimension_numbers<[2], [2], [1], [1], [0, 0, 0, 1, 1, 1], [0], [0]>} : vector<4x8x8xf32>, vector<4x8x8xf32>, vector<4x8x8xf32> -> vector<4x8x8xf32>
    "tpu.trace_stop"() : () -> ()
    %97 = vector.extract_strided_slice %1 {offsets = [1, 0], sizes = [1, 8], strides = [1, 1]} : vector<2x8xf32> to vector<1x8xf32>
    %98 = vector.shape_cast %97 : vector<1x8xf32> to vector<1x1x8xf32>
    %99 = vector.broadcast %98 : vector<1x1x8xf32> to vector<4x8x8xf32>
    %100 = arith.addf %96, %99 : vector<4x8x8xf32>
    %cst_29 = arith.constant dense<0xFF800000> : vector<4x8xf32>
    %101 = vector.multi_reduction <maximumf>, %100, %cst_29 [2] : vector<4x8x8xf32> to vector<4x8xf32>
    %102 = vector.shape_cast %101 : vector<4x8xf32> to vector<4x8x1xf32>
    %103 = vector.broadcast %102 : vector<4x8x1xf32> to vector<4x8x8xf32>
    %104 = arith.subf %100, %103 : vector<4x8x8xf32>
    %105 = math.exp %104 : vector<4x8x8xf32>
    %cst_30 = arith.constant dense<0.000000e+00> : vector<4x8xf32>
    %106 = vector.multi_reduction <add>, %105, %cst_30 [2] : vector<4x8x8xf32> to vector<4x8xf32>
    %107 = vector.shape_cast %106 : vector<4x8xf32> to vector<4x8x1xf32>
    %108 = vector.broadcast %107 : vector<4x8x1xf32> to vector<4x8x8xf32>
    %109 = arith.divf %105, %108 : vector<4x8x8xf32>
    "tpu.trace_start"() <{level = 10 : i32, message = "hqk,hkd->hqd"}> : () -> ()
    %cst_31 = arith.constant dense<0.000000e+00> : vector<4x8x8xf32>
    %110 = tpu.matmul %109, %95, %cst_31 {dimension_numbers = #tpu.dot_dimension_numbers<[2], [1], [1], [2], [0, 0, 0, 1, 1, 2], [0], [0]>} : vector<4x8x8xf32>, vector<4x8x8xf32>, vector<4x8x8xf32> -> vector<4x8x8xf32>
    "tpu.trace_stop"() : () -> ()
    %111 = tpu.concatenate %92, %110 in 1 : vector<4x8x8xf32>, vector<4x8x8xf32> -> vector<4x16x8xf32>
    "tpu.trace_start"() <{level = 10 : i32, message = "hnd,hde->hne"}> : () -> ()
    %cst_32 = arith.constant dense<0.000000e+00> : vector<4x16x32xf32>
    %112 = tpu.matmul %111, %5, %cst_32 {dimension_numbers = #tpu.dot_dimension_numbers<[2], [1], [1], [2], [0, 0, 0, 1, 1, 2], [0], [0]>} : vector<4x16x8xf32>, vector<4x8x32xf32>, vector<4x16x32xf32> -> vector<4x16x32xf32>
    "tpu.trace_stop"() : () -> ()
    %cst_33 = arith.constant dense<0.000000e+00> : vector<16x32xf32>
    %113 = vector.multi_reduction <add>, %112, %cst_33 [0] : vector<4x16x32xf32> to vector<16x32xf32>
    %114 = arith.addf %0, %113 : vector<16x32xf32>
    %115 = vector.broadcast %15 : vector<1x32xf32> to vector<16x32xf32>
    %116 = arith.addf %114, %115 : vector<16x32xf32>
    %cst_34 = arith.constant dense<0.000000e+00> : vector<16xf32>
    %117 = vector.multi_reduction <add>, %116, %cst_34 [1] : vector<16x32xf32> to vector<16xf32>
    %118 = vector.shape_cast %117 : vector<16xf32> to vector<16x1xf32>
    %cst_35 = arith.constant 3.200000e+01 : f32
    %119 = vector.broadcast %cst_35 : f32 to vector<16x1xf32>
    %120 = arith.divf %118, %119 : vector<16x1xf32>
    %121 = vector.broadcast %120 : vector<16x1xf32> to vector<16x32xf32>
    %122 = arith.subf %116, %121 : vector<16x32xf32>
    %123 = arith.mulf %122, %122 : vector<16x32xf32>
    %cst_36 = arith.constant dense<0.000000e+00> : vector<16xf32>
    %124 = vector.multi_reduction <add>, %123, %cst_36 [1] : vector<16x32xf32> to vector<16xf32>
    %125 = vector.shape_cast %124 : vector<16xf32> to vector<16x1xf32>
    %cst_37 = arith.constant 3.200000e+01 : f32
    %126 = vector.broadcast %cst_37 : f32 to vector<16x1xf32>
    %127 = arith.divf %125, %126 : vector<16x1xf32>
    %128 = vector.broadcast %120 : vector<16x1xf32> to vector<16x32xf32>
    %129 = arith.subf %116, %128 : vector<16x32xf32>
    %cst_38 = arith.constant 9.99999997E-7 : f32
    %130 = vector.broadcast %cst_38 : f32 to vector<16x1xf32>
    %131 = arith.addf %127, %130 : vector<16x1xf32>
    %132 = math.rsqrt %131 : vector<16x1xf32>
    %133 = vector.broadcast %132 : vector<16x1xf32> to vector<16x32xf32>
    %134 = arith.mulf %129, %133 : vector<16x32xf32>
    %135 = vector.broadcast %16 : vector<1x32xf32> to vector<16x32xf32>
    %136 = arith.mulf %134, %135 : vector<16x32xf32>
    %137 = vector.broadcast %17 : vector<1x32xf32> to vector<16x32xf32>
    %138 = arith.addf %136, %137 : vector<16x32xf32>
    %cst_39 = arith.constant dense<0.000000e+00> : vector<16x64xf32>
    %139 = tpu.matmul %138, %7, %cst_39 {dimension_numbers = #tpu.dot_dimension_numbers<[1], [0], [0], [1], [0, 0, 1, 1], [], []>} : vector<16x32xf32>, vector<32x64xf32>, vector<16x64xf32> -> vector<16x64xf32>
    %140 = vector.broadcast %18 : vector<1x64xf32> to vector<16x64xf32>
    %141 = arith.addf %139, %140 : vector<16x64xf32>
    %cst_40 = arith.constant 0.000000e+00 : f32
    %142 = vector.broadcast %cst_40 : f32 to vector<16x64xf32>
    %143 = arith.maximumf %141, %142 : vector<16x64xf32>
    %cst_41 = arith.constant dense<0.000000e+00> : vector<16x32xf32>
    %144 = tpu.matmul %143, %9, %cst_41 {dimension_numbers = #tpu.dot_dimension_numbers<[1], [0], [0], [1], [0, 0, 1, 1], [], []>} : vector<16x64xf32>, vector<64x32xf32>, vector<16x32xf32> -> vector<16x32xf32>
    %145 = arith.addf %116, %144 : vector<16x32xf32>
    %146 = vector.broadcast %19 : vector<1x32xf32> to vector<16x32xf32>
    %147 = arith.addf %145, %146 : vector<16x32xf32>
    %c1 = arith.constant 1 : index
    %c0_42 = arith.constant 0 : index
    %c0_43 = arith.constant 0 : index
    %148 = vector.load %arg2[%c1, %c0_42, %c0_43] : memref<2x32x96xf32, #tpu.memory_space<vmem>>, vector<1x32x96xf32>
    %149 = vector.shape_cast %148 : vector<1x32x96xf32> to vector<32x96xf32>
    %c1_44 = arith.constant 1 : index
    %c0_45 = arith.constant 0 : index
    %c0_46 = arith.constant 0 : index
    %c0_47 = arith.constant 0 : index
    %150 = vector.load %arg3[%c1_44, %c0_45, %c0_46, %c0_47] : memref<2x4x8x32xf32, #tpu.memory_space<vmem>>, vector<1x4x8x32xf32>
    %151 = vector.shape_cast %150 : vector<1x4x8x32xf32> to vector<4x8x32xf32>
    %c1_48 = arith.constant 1 : index
    %c0_49 = arith.constant 0 : index
    %c0_50 = arith.constant 0 : index
    %152 = vector.load %arg4[%c1_48, %c0_49, %c0_50] : memref<2x32x64xf32, #tpu.memory_space<vmem>>, vector<1x32x64xf32>
    %153 = vector.shape_cast %152 : vector<1x32x64xf32> to vector<32x64xf32>
    %c1_51 = arith.constant 1 : index
    %c0_52 = arith.constant 0 : index
    %c0_53 = arith.constant 0 : index
    %154 = vector.load %arg5[%c1_51, %c0_52, %c0_53] : memref<2x64x32xf32, #tpu.memory_space<vmem>>, vector<1x64x32xf32>
    %155 = vector.shape_cast %154 : vector<1x64x32xf32> to vector<64x32xf32>
    %c1_54 = arith.constant 1 : index
    %c0_55 = arith.constant 0 : index
    %c0_56 = arith.constant 0 : index
    %156 = vector.load %arg6[%c1_54, %c0_55, %c0_56] : memref<2x8x128xf32, #tpu.memory_space<vmem>>, vector<1x8x128xf32>
    %157 = vector.shape_cast %156 : vector<1x8x128xf32> to vector<8x128xf32>
    %158 = vector.extract_strided_slice %157 {offsets = [0, 0], sizes = [1, 32], strides = [1, 1]} : vector<8x128xf32> to vector<1x32xf32>
    %159 = vector.extract_strided_slice %157 {offsets = [1, 0], sizes = [1, 32], strides = [1, 1]} : vector<8x128xf32> to vector<1x32xf32>
    %160 = vector.extract_strided_slice %157 {offsets = [2, 0], sizes = [1, 96], strides = [1, 1]} : vector<8x128xf32> to vector<1x96xf32>
    %161 = vector.extract_strided_slice %157 {offsets = [3, 0], sizes = [1, 32], strides = [1, 1]} : vector<8x128xf32> to vector<1x32xf32>
    %162 = vector.extract_strided_slice %157 {offsets = [4, 0], sizes = [1, 32], strides = [1, 1]} : vector<8x128xf32> to vector<1x32xf32>
    %163 = vector.extract_strided_slice %157 {offsets = [5, 0], sizes = [1, 32], strides = [1, 1]} : vector<8x128xf32> to vector<1x32xf32>
    %164 = vector.extract_strided_slice %157 {offsets = [6, 0], sizes = [1, 64], strides = [1, 1]} : vector<8x128xf32> to vector<1x64xf32>
    %165 = vector.extract_strided_slice %157 {offsets = [7, 0], sizes = [1, 32], strides = [1, 1]} : vector<8x128xf32> to vector<1x32xf32>
    %cst_57 = arith.constant dense<0.000000e+00> : vector<16xf32>
    %166 = vector.multi_reduction <add>, %147, %cst_57 [1] : vector<16x32xf32> to vector<16xf32>
    %167 = vector.shape_cast %166 : vector<16xf32> to vector<16x1xf32>
    %cst_58 = arith.constant 3.200000e+01 : f32
    %168 = vector.broadcast %cst_58 : f32 to vector<16x1xf32>
    %169 = arith.divf %167, %168 : vector<16x1xf32>
    %170 = vector.broadcast %169 : vector<16x1xf32> to vector<16x32xf32>
    %171 = arith.subf %147, %170 : vector<16x32xf32>
    %172 = arith.mulf %171, %171 : vector<16x32xf32>
    %cst_59 = arith.constant dense<0.000000e+00> : vector<16xf32>
    %173 = vector.multi_reduction <add>, %172, %cst_59 [1] : vector<16x32xf32> to vector<16xf32>
    %174 = vector.shape_cast %173 : vector<16xf32> to vector<16x1xf32>
    %cst_60 = arith.constant 3.200000e+01 : f32
    %175 = vector.broadcast %cst_60 : f32 to vector<16x1xf32>
    %176 = arith.divf %174, %175 : vector<16x1xf32>
    %177 = vector.broadcast %169 : vector<16x1xf32> to vector<16x32xf32>
    %178 = arith.subf %147, %177 : vector<16x32xf32>
    %cst_61 = arith.constant 9.99999997E-7 : f32
    %179 = vector.broadcast %cst_61 : f32 to vector<16x1xf32>
    %180 = arith.addf %176, %179 : vector<16x1xf32>
    %181 = math.rsqrt %180 : vector<16x1xf32>
    %182 = vector.broadcast %181 : vector<16x1xf32> to vector<16x32xf32>
    %183 = arith.mulf %178, %182 : vector<16x32xf32>
    %184 = vector.broadcast %158 : vector<1x32xf32> to vector<16x32xf32>
    %185 = arith.mulf %183, %184 : vector<16x32xf32>
    %186 = vector.broadcast %159 : vector<1x32xf32> to vector<16x32xf32>
    %187 = arith.addf %185, %186 : vector<16x32xf32>
    %cst_62 = arith.constant dense<0.000000e+00> : vector<16x96xf32>
    %188 = tpu.matmul %187, %149, %cst_62 {dimension_numbers = #tpu.dot_dimension_numbers<[1], [0], [0], [1], [0, 0, 1, 1], [], []>} : vector<16x32xf32>, vector<32x96xf32>, vector<16x96xf32> -> vector<16x96xf32>
    %189 = vector.broadcast %160 : vector<1x96xf32> to vector<16x96xf32>
    %190 = arith.addf %188, %189 : vector<16x96xf32>
    %191 = vector.extract_strided_slice %190 {offsets = [0, 0], sizes = [16, 32], strides = [1, 1]} : vector<16x96xf32> to vector<16x32xf32>
    %192 = vector.extract_strided_slice %190 {offsets = [0, 32], sizes = [16, 32], strides = [1, 1]} : vector<16x96xf32> to vector<16x32xf32>
    %193 = vector.extract_strided_slice %190 {offsets = [0, 64], sizes = [16, 32], strides = [1, 1]} : vector<16x96xf32> to vector<16x32xf32>
    %194 = vector.extract_strided_slice %191 {offsets = [0, 0], sizes = [16, 8], strides = [1, 1]} : vector<16x32xf32> to vector<16x8xf32>
    %195 = vector.extract_strided_slice %191 {offsets = [0, 8], sizes = [16, 8], strides = [1, 1]} : vector<16x32xf32> to vector<16x8xf32>
    %196 = vector.extract_strided_slice %191 {offsets = [0, 16], sizes = [16, 8], strides = [1, 1]} : vector<16x32xf32> to vector<16x8xf32>
    %197 = vector.extract_strided_slice %191 {offsets = [0, 24], sizes = [16, 8], strides = [1, 1]} : vector<16x32xf32> to vector<16x8xf32>
    %198 = vector.shape_cast %194 : vector<16x8xf32> to vector<1x16x8xf32>
    %199 = vector.shape_cast %195 : vector<16x8xf32> to vector<1x16x8xf32>
    %200 = vector.shape_cast %196 : vector<16x8xf32> to vector<1x16x8xf32>
    %201 = vector.shape_cast %197 : vector<16x8xf32> to vector<1x16x8xf32>
    %202 = tpu.concatenate %198, %199, %200, %201 in 0 : vector<1x16x8xf32>, vector<1x16x8xf32>, vector<1x16x8xf32>, vector<1x16x8xf32> -> vector<4x16x8xf32>
    %203 = vector.extract_strided_slice %192 {offsets = [0, 0], sizes = [16, 8], strides = [1, 1]} : vector<16x32xf32> to vector<16x8xf32>
    %204 = vector.extract_strided_slice %192 {offsets = [0, 8], sizes = [16, 8], strides = [1, 1]} : vector<16x32xf32> to vector<16x8xf32>
    %205 = vector.extract_strided_slice %192 {offsets = [0, 16], sizes = [16, 8], strides = [1, 1]} : vector<16x32xf32> to vector<16x8xf32>
    %206 = vector.extract_strided_slice %192 {offsets = [0, 24], sizes = [16, 8], strides = [1, 1]} : vector<16x32xf32> to vector<16x8xf32>
    %207 = vector.shape_cast %203 : vector<16x8xf32> to vector<1x16x8xf32>
    %208 = vector.shape_cast %204 : vector<16x8xf32> to vector<1x16x8xf32>
    %209 = vector.shape_cast %205 : vector<16x8xf32> to vector<1x16x8xf32>
    %210 = vector.shape_cast %206 : vector<16x8xf32> to vector<1x16x8xf32>
    %211 = tpu.concatenate %207, %208, %209, %210 in 0 : vector<1x16x8xf32>, vector<1x16x8xf32>, vector<1x16x8xf32>, vector<1x16x8xf32> -> vector<4x16x8xf32>
    %212 = vector.extract_strided_slice %193 {offsets = [0, 0], sizes = [16, 8], strides = [1, 1]} : vector<16x32xf32> to vector<16x8xf32>
    %213 = vector.extract_strided_slice %193 {offsets = [0, 8], sizes = [16, 8], strides = [1, 1]} : vector<16x32xf32> to vector<16x8xf32>
    %214 = vector.extract_strided_slice %193 {offsets = [0, 16], sizes = [16, 8], strides = [1, 1]} : vector<16x32xf32> to vector<16x8xf32>
    %215 = vector.extract_strided_slice %193 {offsets = [0, 24], sizes = [16, 8], strides = [1, 1]} : vector<16x32xf32> to vector<16x8xf32>
    %216 = vector.shape_cast %212 : vector<16x8xf32> to vector<1x16x8xf32>
    %217 = vector.shape_cast %213 : vector<16x8xf32> to vector<1x16x8xf32>
    %218 = vector.shape_cast %214 : vector<16x8xf32> to vector<1x16x8xf32>
    %219 = vector.shape_cast %215 : vector<16x8xf32> to vector<1x16x8xf32>
    %220 = tpu.concatenate %216, %217, %218, %219 in 0 : vector<1x16x8xf32>, vector<1x16x8xf32>, vector<1x16x8xf32>, vector<1x16x8xf32> -> vector<4x16x8xf32>
    %221 = vector.extract_strided_slice %202 {offsets = [0, 0, 0], sizes = [4, 8, 8], strides = [1, 1, 1]} : vector<4x16x8xf32> to vector<4x8x8xf32>
    %222 = vector.extract_strided_slice %211 {offsets = [0, 0, 0], sizes = [4, 8, 8], strides = [1, 1, 1]} : vector<4x16x8xf32> to vector<4x8x8xf32>
    %223 = vector.extract_strided_slice %220 {offsets = [0, 0, 0], sizes = [4, 8, 8], strides = [1, 1, 1]} : vector<4x16x8xf32> to vector<4x8x8xf32>
    "tpu.trace_start"() <{level = 10 : i32, message = "hqd,hkd->hqk"}> : () -> ()
    %cst_63 = arith.constant dense<0.000000e+00> : vector<4x8x8xf32>
    %224 = tpu.matmul %221, %222, %cst_63 {dimension_numbers = #tpu.dot_dimension_numbers<[2], [2], [1], [1], [0, 0, 0, 1, 1, 1], [0], [0]>} : vector<4x8x8xf32>, vector<4x8x8xf32>, vector<4x8x8xf32> -> vector<4x8x8xf32>
    "tpu.trace_stop"() : () -> ()
    %225 = vector.extract_strided_slice %1 {offsets = [0, 0], sizes = [1, 8], strides = [1, 1]} : vector<2x8xf32> to vector<1x8xf32>
    %226 = vector.shape_cast %225 : vector<1x8xf32> to vector<1x1x8xf32>
    %227 = vector.broadcast %226 : vector<1x1x8xf32> to vector<4x8x8xf32>
    %228 = arith.addf %224, %227 : vector<4x8x8xf32>
    %cst_64 = arith.constant dense<0xFF800000> : vector<4x8xf32>
    %229 = vector.multi_reduction <maximumf>, %228, %cst_64 [2] : vector<4x8x8xf32> to vector<4x8xf32>
    %230 = vector.shape_cast %229 : vector<4x8xf32> to vector<4x8x1xf32>
    %231 = vector.broadcast %230 : vector<4x8x1xf32> to vector<4x8x8xf32>
    %232 = arith.subf %228, %231 : vector<4x8x8xf32>
    %233 = math.exp %232 : vector<4x8x8xf32>
    %cst_65 = arith.constant dense<0.000000e+00> : vector<4x8xf32>
    %234 = vector.multi_reduction <add>, %233, %cst_65 [2] : vector<4x8x8xf32> to vector<4x8xf32>
    %235 = vector.shape_cast %234 : vector<4x8xf32> to vector<4x8x1xf32>
    %236 = vector.broadcast %235 : vector<4x8x1xf32> to vector<4x8x8xf32>
    %237 = arith.divf %233, %236 : vector<4x8x8xf32>
    "tpu.trace_start"() <{level = 10 : i32, message = "hqk,hkd->hqd"}> : () -> ()
    %cst_66 = arith.constant dense<0.000000e+00> : vector<4x8x8xf32>
    %238 = tpu.matmul %237, %223, %cst_66 {dimension_numbers = #tpu.dot_dimension_numbers<[2], [1], [1], [2], [0, 0, 0, 1, 1, 2], [0], [0]>} : vector<4x8x8xf32>, vector<4x8x8xf32>, vector<4x8x8xf32> -> vector<4x8x8xf32>
    "tpu.trace_stop"() : () -> ()
    %239 = vector.extract_strided_slice %202 {offsets = [0, 8, 0], sizes = [4, 8, 8], strides = [1, 1, 1]} : vector<4x16x8xf32> to vector<4x8x8xf32>
    %240 = vector.extract_strided_slice %211 {offsets = [0, 8, 0], sizes = [4, 8, 8], strides = [1, 1, 1]} : vector<4x16x8xf32> to vector<4x8x8xf32>
    %241 = vector.extract_strided_slice %220 {offsets = [0, 8, 0], sizes = [4, 8, 8], strides = [1, 1, 1]} : vector<4x16x8xf32> to vector<4x8x8xf32>
    "tpu.trace_start"() <{level = 10 : i32, message = "hqd,hkd->hqk"}> : () -> ()
    %cst_67 = arith.constant dense<0.000000e+00> : vector<4x8x8xf32>
    %242 = tpu.matmul %239, %240, %cst_67 {dimension_numbers = #tpu.dot_dimension_numbers<[2], [2], [1], [1], [0, 0, 0, 1, 1, 1], [0], [0]>} : vector<4x8x8xf32>, vector<4x8x8xf32>, vector<4x8x8xf32> -> vector<4x8x8xf32>
    "tpu.trace_stop"() : () -> ()
    %243 = vector.extract_strided_slice %1 {offsets = [1, 0], sizes = [1, 8], strides = [1, 1]} : vector<2x8xf32> to vector<1x8xf32>
    %244 = vector.shape_cast %243 : vector<1x8xf32> to vector<1x1x8xf32>
    %245 = vector.broadcast %244 : vector<1x1x8xf32> to vector<4x8x8xf32>
    %246 = arith.addf %242, %245 : vector<4x8x8xf32>
    %cst_68 = arith.constant dense<0xFF800000> : vector<4x8xf32>
    %247 = vector.multi_reduction <maximumf>, %246, %cst_68 [2] : vector<4x8x8xf32> to vector<4x8xf32>
    %248 = vector.shape_cast %247 : vector<4x8xf32> to vector<4x8x1xf32>
    %249 = vector.broadcast %248 : vector<4x8x1xf32> to vector<4x8x8xf32>
    %250 = arith.subf %246, %249 : vector<4x8x8xf32>
    %251 = math.exp %250 : vector<4x8x8xf32>
    %cst_69 = arith.constant dense<0.000000e+00> : vector<4x8xf32>
    %252 = vector.multi_reduction <add>, %251, %cst_69 [2] : vector<4x8x8xf32> to vector<4x8xf32>
    %253 = vector.shape_cast %252 : vector<4x8xf32> to vector<4x8x1xf32>
    %254 = vector.broadcast %253 : vector<4x8x1xf32> to vector<4x8x8xf32>
    %255 = arith.divf %251, %254 : vector<4x8x8xf32>
    "tpu.trace_start"() <{level = 10 : i32, message = "hqk,hkd->hqd"}> : () -> ()
    %cst_70 = arith.constant dense<0.000000e+00> : vector<4x8x8xf32>
    %256 = tpu.matmul %255, %241, %cst_70 {dimension_numbers = #tpu.dot_dimension_numbers<[2], [1], [1], [2], [0, 0, 0, 1, 1, 2], [0], [0]>} : vector<4x8x8xf32>, vector<4x8x8xf32>, vector<4x8x8xf32> -> vector<4x8x8xf32>
    "tpu.trace_stop"() : () -> ()
    %257 = tpu.concatenate %238, %256 in 1 : vector<4x8x8xf32>, vector<4x8x8xf32> -> vector<4x16x8xf32>
    "tpu.trace_start"() <{level = 10 : i32, message = "hnd,hde->hne"}> : () -> ()
    %cst_71 = arith.constant dense<0.000000e+00> : vector<4x16x32xf32>
    %258 = tpu.matmul %257, %151, %cst_71 {dimension_numbers = #tpu.dot_dimension_numbers<[2], [1], [1], [2], [0, 0, 0, 1, 1, 2], [0], [0]>} : vector<4x16x8xf32>, vector<4x8x32xf32>, vector<4x16x32xf32> -> vector<4x16x32xf32>
    "tpu.trace_stop"() : () -> ()
    %cst_72 = arith.constant dense<0.000000e+00> : vector<16x32xf32>
    %259 = vector.multi_reduction <add>, %258, %cst_72 [0] : vector<4x16x32xf32> to vector<16x32xf32>
    %260 = arith.addf %147, %259 : vector<16x32xf32>
    %261 = vector.broadcast %161 : vector<1x32xf32> to vector<16x32xf32>
    %262 = arith.addf %260, %261 : vector<16x32xf32>
    %cst_73 = arith.constant dense<0.000000e+00> : vector<16xf32>
    %263 = vector.multi_reduction <add>, %262, %cst_73 [1] : vector<16x32xf32> to vector<16xf32>
    %264 = vector.shape_cast %263 : vector<16xf32> to vector<16x1xf32>
    %cst_74 = arith.constant 3.200000e+01 : f32
    %265 = vector.broadcast %cst_74 : f32 to vector<16x1xf32>
    %266 = arith.divf %264, %265 : vector<16x1xf32>
    %267 = vector.broadcast %266 : vector<16x1xf32> to vector<16x32xf32>
    %268 = arith.subf %262, %267 : vector<16x32xf32>
    %269 = arith.mulf %268, %268 : vector<16x32xf32>
    %cst_75 = arith.constant dense<0.000000e+00> : vector<16xf32>
    %270 = vector.multi_reduction <add>, %269, %cst_75 [1] : vector<16x32xf32> to vector<16xf32>
    %271 = vector.shape_cast %270 : vector<16xf32> to vector<16x1xf32>
    %cst_76 = arith.constant 3.200000e+01 : f32
    %272 = vector.broadcast %cst_76 : f32 to vector<16x1xf32>
    %273 = arith.divf %271, %272 : vector<16x1xf32>
    %274 = vector.broadcast %266 : vector<16x1xf32> to vector<16x32xf32>
    %275 = arith.subf %262, %274 : vector<16x32xf32>
    %cst_77 = arith.constant 9.99999997E-7 : f32
    %276 = vector.broadcast %cst_77 : f32 to vector<16x1xf32>
    %277 = arith.addf %273, %276 : vector<16x1xf32>
    %278 = math.rsqrt %277 : vector<16x1xf32>
    %279 = vector.broadcast %278 : vector<16x1xf32> to vector<16x32xf32>
    %280 = arith.mulf %275, %279 : vector<16x32xf32>
    %281 = vector.broadcast %162 : vector<1x32xf32> to vector<16x32xf32>
    %282 = arith.mulf %280, %281 : vector<16x32xf32>
    %283 = vector.broadcast %163 : vector<1x32xf32> to vector<16x32xf32>
    %284 = arith.addf %282, %283 : vector<16x32xf32>
    %cst_78 = arith.constant dense<0.000000e+00> : vector<16x64xf32>
    %285 = tpu.matmul %284, %153, %cst_78 {dimension_numbers = #tpu.dot_dimension_numbers<[1], [0], [0], [1], [0, 0, 1, 1], [], []>} : vector<16x32xf32>, vector<32x64xf32>, vector<16x64xf32> -> vector<16x64xf32>
    %286 = vector.broadcast %164 : vector<1x64xf32> to vector<16x64xf32>
    %287 = arith.addf %285, %286 : vector<16x64xf32>
    %cst_79 = arith.constant 0.000000e+00 : f32
    %288 = vector.broadcast %cst_79 : f32 to vector<16x64xf32>
    %289 = arith.maximumf %287, %288 : vector<16x64xf32>
    %cst_80 = arith.constant dense<0.000000e+00> : vector<16x32xf32>
    %290 = tpu.matmul %289, %155, %cst_80 {dimension_numbers = #tpu.dot_dimension_numbers<[1], [0], [0], [1], [0, 0, 1, 1], [], []>} : vector<16x64xf32>, vector<64x32xf32>, vector<16x32xf32> -> vector<16x32xf32>
    %291 = arith.addf %262, %290 : vector<16x32xf32>
    %292 = vector.broadcast %165 : vector<1x32xf32> to vector<16x32xf32>
    %293 = arith.addf %291, %292 : vector<16x32xf32>
    %c0_81 = arith.constant 0 : index
    %c0_82 = arith.constant 0 : index
    %294 = vector.load %arg7[%c0_81, %c0_82] : memref<16x32xf32, #tpu.memory_space<vmem>>, vector<16x32xf32>
    tpu.vector_store %arg7[%c0_81, %c0_82], %293 {strides = array<i32>} : memref<16x32xf32, #tpu.memory_space<vmem>>, vector<16x32xf32>,
    return
  }
}

</mosaic_0001>

<bundles_post_ra>
// kernel: encoder_forward.1
= control target key start
LH: loop header
LB: loop body
LE: loop exit
PB: predicated region body
PF: predicated region fallthrough
CT: control target
= control target key end

     0   :  { %12 = vsyncpa [#allocation3], 0  ;;  %s5488_s0 = inlined_call_operand.hbm [shape: f32[16,32], index: 0, kind: input, shape index: {}]   ;;  %s5489_s1 = inlined_call_operand.vmem [shape: f32[2,8], index: 1, kind: input, shape index: {}]   ;;  %s5490_s2 = inlined_call_operand.vmem [shape: f32[2,32,96], index: 2, kind: input, shape index: {}]   ;;  %s5491_s3 = inlined_call_operand.vmem [shape: f32[2,4,8,32], index: 3, kind: input, shape index: {}]   ;;  %s5492_s4 = inlined_call_operand.vmem [shape: f32[2,32,64], index: 4, kind: input, shape index: {}]   ;;  %s5493_s5 = inlined_call_operand.vmem [shape: f32[2,64,32], index: 5, kind: input, shape index: {}]   ;;  %s5494_s6 = inlined_call_operand.hbm [shape: f32[2,8,128], index: 6, kind: input, shape index: {}]   ;;  %s5495_s7 = inlined_call_operand.hbm [shape: f32[16,32], index: 7, kind: output, shape index: {}]  }
   0x1   :  { %13 = vsyncpa [#allocation6], 0 }
   0x2   :  { %14 = vsyncpa [#allocation4], 0  ;;  %s4807_s24 = smov [#allocation2]  }
   0x3   :  { %s20_s25 = sshll.u32 %s4807_s24, 4  ;;  %s21_s25 = int_to_ptr.vmem [resolvable:$true] %s20_s25 }
   0x4   :  { %s4749_s26 = scalar_lea.vmem %s21_s25, 256  ;;  %p4754_p1 = scmp.lt.s32.totalorder %s21_s25, %s21_s25 }
   0x5   :  { %p4750_p0 = scmp.ne.s32.totalorder %s21_s25, %s4749_s26  ;;  %p4755_p2 = scmp.lt.s32.totalorder %s4749_s26, %s4749_s26 }
   0x7   :  { %p4756_p3 = por %p4755_p2, %p4754_p1 }
   0x9   :  { %p4757_p4 = pnand %p4756_p3, %p4750_p0 }
   0xb   :  { %4760 = shalt.err (!%p4757_p4)
}
   0xc   :  { %s4808_s27 = smov 128   ;;  %s4809_s28 = smov 8  }
   0xd   :  { %26 = dma.hbm_to_vmem [thread:$0]  %s5488_s0, 256, %s21_s25, [#allocation3], %s4808_s27, %s4808_s27, %s4809_s28  }
   0xe   :  { %s4810_s8 = smov [#allocation5]  }
   0xf   :  { %s42_s9 = sshll.u32 %s4810_s8, 4  ;;  %s43_s9 = int_to_ptr.vmem [resolvable:$true] %s42_s9 }
  0x10   :  { %s4769_s10 = scalar_lea.vmem %s43_s9, 256  ;;  %p4774_p6 = scmp.lt.s32.totalorder %s43_s9, %s43_s9 }
  0x11   :  { %p4770_p5 = scmp.ne.s32.totalorder %s43_s9, %s4769_s10  ;;  %p4775_p7 = scmp.lt.s32.totalorder %s4769_s10, %s4769_s10 }
  0x13   :  { %p4776_p8 = por %p4775_p7, %p4774_p6 }
  0x15   :  { %p4777_p9 = pnand %p4776_p8, %p4770_p5 }
  0x17   :  { %4780 = shalt.err (!%p4777_p9)
}
  0x18   :  { %48 = dma.hbm_to_vmem [thread:$0]  %s5494_s6, 256, %s43_s9, [#allocation6], %s4808_s27, %s4808_s27, %s4809_s28  }
  0x19   :  { %4801 = dma.done.wait [#allocation3], 256  }
  0x1a   :  { %4802 = vsyncadd [#allocation3], 4294967040 }
  0x1b   :  { %4803 = dma.done.wait [#allocation6], 256  }
  0x1c   :  { %4804 = vsyncadd [#allocation6], 4294967040  ;;  %vm79_vm0 = vcmask 261120   ;;  %v4871_v0 = vld [vmem:[#allocation2] sm:$0xff]  ;;  %v4873_v1 = vld [vmem:[#allocation2 + $0x8] sm:$0xff]  ;;  %v107_v23 = vlaneseq  ;;  %v4811_v41 = vmov 0.0  }
  0x1d   :  { %v80_v2 = vsel %vm79_vm0, %v4871_v0, 0.0  ;;  %v83_v3 = vsel %vm79_vm0, %v4873_v1, 0.0  ;;  %v61_v14 = vld [vmem:[%s5490_s2 + $0x18] sm:$0xff]  ;;  %v60_v15 = vld [vmem:[%s5490_s2 + $0x10] sm:$0xff]  ;;  %v59_v16 = vld [vmem:[%s5490_s2 + $0x8] sm:$0xff]  ;;  %4383 = vmatprep.subr.mxu1 %v4811_v41  ;;  %vm4812_vm1 = vmmov 0  }
  0x1e   :  { %81 = vadd.xlane.f32.xlu0 %v80_v2  ;;  %4367 = vmatprep.subr.mxu0 %v61_v14  ;;  %v58_v17 = vld [vmem:[%s5490_s2] sm:$0xff]  ;;  %v4895_v25 = vshrl.u32 %v107_v23, 7  ;;  %v4900_v27 = vld [vmem:[#allocation5] sm:$0xff]  ;;  %s4813_s19 = smov 112   ;;  %s4814_s20 = smov 120   ;;  %vm224_vm2 = vcmask 64512  }
  0x1f   :  { %4368 = vmatpush3.msra.mxu0 %v61_v14  ;;  %4385 = vmatprep.mubr.msk.f32.mxu1 %vm4812_vm1, %v4811_v41  ;;  %s4815_s21 = smov 104   ;;  %s4816_s22 = smov 96   ;;  %v4960_v53 = vld [vmem:[%s5489_s1] sm:$0x3]  ;;  %vm2002_vm3 = vcmask 523264  }
  0x20   :  { %4369 = vmatprep.subr.mxu0 %v60_v15  ;;  %v4898_v26 = vsub.s32 0, %v4895_v25  ;;  %v4903_v28 = vsub.s32 1, %v4895_v25  ;;  %v121_v39 = vsub.s32 2, %v4895_v25  ;;  %s4817_s25 = smov 64  }
  0x21   :  { %4370 = vmatpush3.msra.mxu0 %v60_v15 }
  0x22   :  { %84 = vadd.xlane.f32.xlu0 %v83_v3  ;;  %4371 = vmatprep.subr.mxu0 %v59_v16  ;;  %v110_v29 = vrot.slane %v4900_v27, %v4898_v26  ;;  %v116_v32 = vrot.slane %v4900_v27, %v4903_v28  ;;  %v122_v40 = vrot.slane %v4900_v27, %v121_v39 }
  0x23   :  { %4372 = vmatpush3.msra.mxu0 %v59_v16  ;;  %v4964_v54 = vrot.slane %v4960_v53, %v4898_v26 }
  0x24   :  { %4373 = vmatprep.subr.mxu0 %v58_v17 }
  0x25   :  { %4374 = vmatpush3.msra.mxu0 %v58_v17 }
  0x26   :  { %4378 = vmatprep.subr.mxu0 %v4811_v41 }
  0xa7   :  { %v82_v4 = vpop.xlane.xlu0 %81 }
  0xa8   :  { %v87_v5 = vmul.f32 0.03125, %v82_v4 }
  0xaa   :  { %v89_v6 = vsub.f32 %v4871_v0, %v87_v5 }
  0xab   :  { %v85_v7 = vpop.xlane.xlu0 %84 }
  0xac   :  { %v88_v8 = vmul.f32 0.03125, %v85_v7  ;;  %v91_v9 = vmul.f32 %v89_v6, %v89_v6 }
  0xae   :  { %v90_v10 = vsub.f32 %v4873_v1, %v88_v8  ;;  %v93_v11 = vsel %vm79_vm0, %v91_v9, 0.0 }
  0xaf   :  { %94 = vadd.xlane.f32.xlu1 %v93_v11 }
  0xb0   :  { %v92_v12 = vmul.f32 %v90_v10, %v90_v10 }
  0xb2   :  { %v96_v13 = vsel %vm79_vm0, %v92_v12, 0.0 }
  0xb3   :  { %97 = vadd.xlane.f32.xlu1 %v96_v13 }
 0x138   :  { %v95_v18 = vpop.xlane.xlu1 %94 }
 0x139   :  { %v99_v19 = vmul.f32 0.03125, %v95_v18 }
 0x13b   :  { %v101_v20 = vadd.f32 1e-06, %v99_v19 }
 0x13c   :  { %v98_v21 = vpop.xlane.xlu1 %97 }
 0x13d   :  { %4661 = vrsqrt.f32 %v101_v20  ;;  %v100_v22 = vmul.f32 0.03125, %v98_v21 }
 0x13f   :  { %v102_v24 = vadd.f32 1e-06, %v100_v22 }
 0x141   :  { %4663 = vrsqrt.f32 %v102_v24 }
 0x14a   :  { %v4662_v30 = vpop.eup %4661 }
 0x14b   :  { %v105_v31 = vmul.f32 %v4662_v30, %v89_v6 }
 0x14d   :  { %v111_v33 = vmul.f32 %v110_v29, %v105_v31 }
 0x14e   :  { %v4664_v34 = vpop.eup %4663 }
 0x14f   :  { %v106_v35 = vmul.f32 %v4664_v34, %v90_v10  ;;  %v117_v36 = vadd.f32 %v116_v32, %v111_v33 }
 0x151   :  { %v112_v37 = vmul.f32 %v110_v29, %v106_v35  ;;  %4375 = vmatprep.mubr.msk.f32.mxu0 %vm79_vm0, %v117_v36 }
 0x153   :  { %v118_v38 = vadd.f32 %v116_v32, %v112_v37 }
 0x155   :  { %4376 = vmatmul.mubr.msk.f32.vlgmr.msra.gmra.mxu0 %vm79_vm0, %v118_v38 }
 0x156   :  { %4380 = vmatprep.mubr.msk.f32.mxu0 %vm4812_vm1, %v4811_v41 }
 0x215   :  { %v4377_v42 = vpop.f32.mrf.mxu0 }
 0x216   :  { %v4917_v43 = vadd.f32 %v4377_v42, %v122_v40 }
 0x217   :  { %v195_v44 = vpop.f32.mrf.mxu0 }
 0x218   :  { %v4923_v45 = vadd.f32 %v195_v44, %v122_v40 }
 0x21a   :  { %210 = vrot.lane.b32.xlu1 %v4923_v45, %s4813_s19  ;;  %206 = vrot.lane.b32.xlu0 %v4923_v45, %s4814_s20 }
 0x21e   :  { %214 = vrot.lane.b32.xlu1 %v4923_v45, %s4815_s21 }
 0x222   :  { %222 = vrot.lane.b32.xlu1 %v4923_v45, %s4816_s22 }
 0x28c   :  { %v211_v46 = vpop.permute.xlu1 %210  ;;  %v207_v47 = vpop.permute.xlu0 %206 }
 0x28d   :  { %375 = vrot.lane.b32.xlu1 %v211_v46, %s4816_s22  ;;  %299 = vrot.lane.b32.xlu0 %v207_v47, %s4816_s22 }
 0x290   :  { %v215_v48 = vpop.permute.xlu1 %214 }
 0x291   :  { %451 = vrot.lane.b32.xlu0 %v215_v48, %s4816_s22 }
 0x294   :  { %v223_v49 = vpop.permute.xlu1 %222 }
 0x295   :  { %4379 = vmatpush3.xpose.msk.msra.mxu0 %vm224_vm2, %v223_v49 }
 0x296   :  { %4388 = vmatprep.subr.mxu0 %v4811_v41 }
 0x298   :  { %4381 = vmatmul.mubr.msk.f32.vlgmr.msra.gmra.mxu0 %vm224_vm2, %v4923_v45 }
 0x299   :  { %4390 = vmatprep.mubr.msk.f32.mxu0 %vm4812_vm1, %v4811_v41 }
 0x2ff   :  { %v376_v50 = vpop.permute.xlu1 %375  ;;  %v300_v51 = vpop.permute.xlu0 %299 }
 0x300   :  { %4384 = vmatpush3.xpose.msk.msra.mxu1 %vm224_vm2, %v300_v51  ;;  %4389 = vmatpush3.xpose.msk.msra.mxu0 %vm224_vm2, %v376_v50 }
 0x301   :  { %4393 = vmatprep.subr.mxu1 %v4811_v41  ;;  %4398 = vmatprep.subr.mxu0 %v4811_v41 }
 0x303   :  { %4386 = vmatmul.mubr.msk.f32.vlgmr.msra.gmra.mxu1 %vm224_vm2, %v207_v47  ;;  %4391 = vmatmul.mubr.msk.f32.vlgmr.msra.gmra.mxu0 %vm224_vm2, %v211_v46  ;;  %v452_v52 = vpop.permute.xlu0 %451 }
 0x304   :  { %4394 = vmatpush3.xpose.msk.msra.mxu1 %vm224_vm2, %v452_v52  ;;  %4395 = vmatprep.mubr.msk.f32.mxu1 %vm4812_vm1, %v4811_v41 }
 0x305   :  { %4403 = vmatprep.subr.mxu1 %v4811_v41  ;;  %4400 = vmatprep.mubr.msk.f32.mxu0 %vm4812_vm1, %v4811_v41 }
 0x307   :  { %4396 = vmatmul.mubr.msk.f32.vlgmr.msra.gmra.mxu1 %vm224_vm2, %v215_v48 }
 0x308   :  { %4405 = vmatprep.mubr.msk.f32.mxu1 %vm4812_vm1, %v4811_v41 }
 0x358   :  { %v295_v55 = vpop.f32.mrf.mxu0 }
 0x359   :  { %v296_v56 = vadd.f32 %v295_v55, %v4964_v54 }
 0x35a   :  { %v4382_v57 = vpop.f32.mrf.mxu0 }
 0x35b   :  { %v527_v58 = vsel %vm224_vm2, %v296_v56, -inf }
 0x35c   :  { %528 = vmax.xlane.f32.xlu1 %v527_v58 }
 0x36d   :  { %208 = vrot.lane.b32.xlu1 %v4917_v43, %s4814_s20 }
 0x371   :  { %216 = vrot.lane.b32.xlu1 %v4917_v43, %s4815_s21 }
 0x375   :  { %647 = vrot.lane.b32.xlu1 %v207_v47, %s4817_s25 }
 0x379   :  { %723 = vrot.lane.b32.xlu1 %v211_v46, %s4817_s25 }
 0x37d   :  { %799 = vrot.lane.b32.xlu1 %v215_v48, %s4817_s25 }
 0x3c3   :  { %v371_v59 = vpop.f32.mrf.mxu1  ;;  %v447_v60 = vpop.f32.mrf.mxu0 }
 0x3c4   :  { %v372_v61 = vadd.f32 %v371_v59, %v4964_v54  ;;  %v448_v2 = vadd.f32 %v447_v60, %v4964_v54 }
 0x3c5   :  { %v4387_v62 = vpop.f32.mrf.mxu1  ;;  %v4392_v63 = vpop.f32.mrf.mxu0 }
 0x3c6   :  { %v530_v3 = vsel %vm224_vm2, %v372_v61, -inf  ;;  %v533_v7 = vsel %vm224_vm2, %v448_v2, -inf }
 0x3c7   :  { %531 = vmax.xlane.f32.xlu0 %v530_v3  ;;  %v523_v4 = vpop.f32.mrf.mxu1 }
 0x3c8   :  { %v524_v6 = vadd.f32 %v523_v4, %v4964_v54  ;;  %v5051_v4 = vrot.slane %v4960_v53, %v4903_v28 }
 0x3c9   :  { %v4397_v5 = vpop.f32.mrf.mxu1 }
 0x3ca   :  { %v536_v8 = vsel %vm224_vm2, %v524_v6, -inf }
 0x3cb   :  { %534 = vmax.xlane.f32.xlu0 %v533_v7 }
 0x3cf   :  { %537 = vmax.xlane.f32.xlu0 %v536_v8 }
 0x3e5   :  { %v529_v9 = vpop.xlane.xlu1 %528  ;;  %212 = vrot.lane.b32.xlu0 %v4917_v43, %s4813_s19 }
 0x3e6   :  { %v539_v10 = vsub.f32 %v296_v56, %v529_v9 }
 0x3e8   :  { %v543_v11 = vmul.f32 1.442695, %v539_v10 }
 0x3e9   :  { %v4983_v12 = vpop.permute.xlu1 %208  ;;  %571 = vrot.lane.b32.xlu0 %v4923_v45, %s4817_s25 }
 0x3ea   :  { %4665 = vpow2.f32 %v543_v11 }
 0x3ed   :  { %v4987_v13 = vpop.permute.xlu1 %216 }
 0x3f1   :  { %v648_v14 = vpop.permute.xlu1 %647 }
 0x3f2   :  { %4404 = vmatpush3.msra.mxu1 %v648_v14 }
 0x3f3   :  { %4413 = vmatprep.subr.mxu1 %v4811_v41 }
 0x3f5   :  { %v724_v38 = vpop.permute.xlu1 %723 }
 0x3f7   :  { %v4666_v15 = vpop.eup %4665 }
 0x3f8   :  { %v551_v16 = vsel %vm224_vm2, %v4666_v15, 0.0 }
 0x3f9   :  { %552 = vadd.xlane.f32.xlu1 %v551_v16  ;;  %v800_v40 = vpop.permute.xlu1 %799 }
 0x40a   :  { %955 = vrot.lane.b32.xlu1 %v4983_v12, %s4816_s22 }
 0x450   :  { %v532_v17 = vpop.xlane.xlu0 %531 }
 0x451   :  { %v540_v18 = vsub.f32 %v372_v61, %v532_v17 }
 0x453   :  { %v545_v19 = vmul.f32 1.442695, %v540_v18 }
 0x454   :  { %v535_v20 = vpop.xlane.xlu0 %534 }
 0x455   :  { %4667 = vpow2.f32 %v545_v19  ;;  %v541_v21 = vsub.f32 %v448_v2, %v535_v20 }
 0x457   :  { %v547_v22 = vmul.f32 1.442695, %v541_v21 }
 0x458   :  { %v538_v23 = vpop.xlane.xlu0 %537 }
 0x459   :  { %4669 = vpow2.f32 %v547_v22  ;;  %v542_v24 = vsub.f32 %v524_v6, %v538_v23 }
 0x45b   :  { %v549_v29 = vmul.f32 1.442695, %v542_v24 }
 0x45c   :  { %v4993_v30 = vpop.permute.xlu0 %212 }
 0x45d   :  { %4671 = vpow2.f32 %v549_v29 }
 0x460   :  { %v572_v31 = vpop.permute.xlu0 %571 }
 0x461   :  { %4399 = vmatpush3.msra.mxu0 %v572_v31 }
 0x462   :  { %v4668_v32 = vpop.eup %4667  ;;  %4408 = vmatprep.subr.mxu0 %v4811_v41 }
 0x463   :  { %v554_v33 = vsel %vm224_vm2, %v4668_v32, 0.0 }
 0x464   :  { %555 = vadd.xlane.f32.xlu0 %v554_v33 }
 0x466   :  { %v4670_v34 = vpop.eup %4669 }
 0x467   :  { %v557_v35 = vsel %vm224_vm2, %v4670_v34, 0.0 }
 0x468   :  { %558 = vadd.xlane.f32.xlu0 %v557_v35 }
 0x46a   :  { %v4672_v36 = vpop.eup %4671 }
 0x46b   :  { %v560_v37 = vsel %vm224_vm2, %v4672_v36, 0.0 }
 0x46c   :  { %561 = vadd.xlane.f32.xlu1 %v560_v37 }
 0x47d   :  { %1107 = vrot.lane.b32.xlu1 %v4987_v13, %s4816_s22 }
 0x47e   :  { %879 = vrot.lane.b32.xlu0 %v4917_v43, %s4816_s22 }
 0x482   :  { %v553_v42 = vpop.xlane.xlu1 %552  ;;  %1031 = vrot.lane.b32.xlu0 %v4993_v30, %s4816_s22 }
 0x483   :  { %4673 = vrcp.f32 %v553_v42 }
 0x486   :  { %v956_v47 = vpop.permute.xlu1 %955 }
 0x490   :  { %v4674_v44 = vpop.eup %4673 }
 0x491   :  { %v564_v45 = vmul.f32 %v4674_v44, %v4666_v15 }
 0x493   :  { %4401 = vmatmul.mubr.msk.f32.vlgmr.msra.gmra.mxu0 %vm224_vm2, %v564_v45 }
 0x494   :  { %4409 = vmatpush3.msra.mxu0 %v724_v38  ;;  %4410 = vmatprep.mubr.msk.f32.mxu0 %vm4812_vm1, %v4811_v41 }
 0x495   :  { %4418 = vmatprep.subr.mxu0 %v4811_v41 }
 0x4ed   :  { %v556_v46 = vpop.xlane.xlu0 %555 }
 0x4ee   :  { %4675 = vrcp.f32 %v556_v46 }
 0x4f1   :  { %v559_v48 = vpop.xlane.xlu0 %558 }
 0x4f2   :  { %4677 = vrcp.f32 %v559_v48 }
 0x4f5   :  { %v562_v49 = vpop.xlane.xlu1 %561  ;;  %v880_v55 = vpop.permute.xlu0 %879 }
 0x4f6   :  { %4679 = vrcp.f32 %v562_v49 }
 0x4f9   :  { %v1032_v59 = vpop.permute.xlu0 %1031  ;;  %v1108_v60 = vpop.permute.xlu1 %1107 }
 0x4fb   :  { %v4676_v50 = vpop.eup %4675 }
 0x4fc   :  { %v566_v51 = vmul.f32 %v4676_v50, %v4668_v32 }
 0x4fe   :  { %4406 = vmatmul.mubr.msk.f32.vlgmr.msra.gmra.mxu1 %vm224_vm2, %v566_v51 }
 0x4ff   :  { %v4678_v52 = vpop.eup %4677  ;;  %4414 = vmatpush3.msra.mxu1 %v800_v40  ;;  %4415 = vmatprep.mubr.msk.f32.mxu1 %vm4812_vm1, %v4811_v41 }
 0x500   :  { %v568_v56 = vmul.f32 %v4678_v52, %v4670_v34  ;;  %4423 = vmatprep.subr.mxu1 %v4811_v41 }
 0x502   :  { %4411 = vmatmul.mubr.msk.f32.vlgmr.msra.gmra.mxu0 %vm224_vm2, %v568_v56 }
 0x503   :  { %v4680_v57 = vpop.eup %4679  ;;  %4419 = vmatpush3.xpose.msk.msra.mxu0 %vm224_vm2, %v880_v55  ;;  %4420 = vmatprep.mubr.msk.f32.mxu0 %vm4812_vm1, %v4811_v41 }
 0x504   :  { %4428 = vmatprep.subr.mxu0 %v4811_v41  ;;  %v570_v58 = vmul.f32 %v4680_v57, %v4672_v36 }
 0x506   :  { %4416 = vmatmul.mubr.msk.f32.vlgmr.msra.gmra.mxu1 %vm224_vm2, %v570_v58  ;;  %4421 = vmatmul.mubr.msk.f32.vlgmr.msra.gmra.mxu0 %vm224_vm2, %v4917_v43 }
 0x507   :  { %4424 = vmatpush3.xpose.msk.msra.mxu1 %vm224_vm2, %v956_v47  ;;  %4429 = vmatpush3.xpose.msk.msra.mxu0 %vm224_vm2, %v1032_v59 }
 0x508   :  { %4425 = vmatprep.mubr.msk.f32.mxu1 %vm4812_vm1, %v4811_v41  ;;  %4430 = vmatprep.mubr.msk.f32.mxu0 %vm4812_vm1, %v4811_v41 }
 0x509   :  { %4433 = vmatprep.subr.mxu1 %v4811_v41  ;;  %4438 = vmatprep.subr.mxu0 %v4811_v41 }
 0x50a   :  { %4426 = vmatmul.mubr.msk.f32.vlgmr.msra.gmra.mxu1 %vm224_vm2, %v4983_v12  ;;  %4431 = vmatmul.mubr.msk.f32.vlgmr.msra.gmra.mxu0 %vm224_vm2, %v4993_v30 }
 0x50b   :  { %4434 = vmatpush3.xpose.msk.msra.mxu1 %vm224_vm2, %v1108_v60  ;;  %4435 = vmatprep.mubr.msk.f32.mxu1 %vm4812_vm1, %v4811_v41 }
 0x50c   :  { %4443 = vmatprep.subr.mxu1 %v4811_v41  ;;  %4440 = vmatprep.mubr.msk.f32.mxu0 %vm4812_vm1, %v4811_v41 }
 0x50e   :  { %4436 = vmatmul.mubr.msk.f32.vlgmr.msra.gmra.mxu1 %vm224_vm2, %v4987_v13 }
 0x50f   :  { %4445 = vmatprep.mubr.msk.f32.mxu1 %vm4812_vm1, %v4811_v41 }
 0x553   :  { %v5043_v61 = vpop.f32.mrf.mxu0 }
 0x555   :  { %v4402_v62 = vpop.f32.mrf.mxu0 }
 0x5be   :  { %v5045_v63 = vpop.f32.mrf.mxu1 }
 0x5c0   :  { %v4407_v2 = vpop.f32.mrf.mxu1 }
 0x5c2   :  { %v5047_v3 = vpop.f32.mrf.mxu0 }
 0x5c4   :  { %v4412_v5 = vpop.f32.mrf.mxu0 }
 0x5c6   :  { %v5053_v6 = vpop.f32.mrf.mxu1  ;;  %v951_v7 = vpop.f32.mrf.mxu0 }
 0x5c7   :  { %v952_v8 = vadd.f32 %v951_v7, %v5051_v4 }
 0x5c8   :  { %v4417_v9 = vpop.f32.mrf.mxu1  ;;  %v4422_v10 = vpop.f32.mrf.mxu0 }
 0x5c9   :  { %v1183_v11 = vsel %vm224_vm2, %v952_v8, -inf }
 0x5ca   :  { %v1027_v14 = vpop.f32.mrf.mxu1  ;;  %1184 = vmax.xlane.f32.xlu0 %v1183_v11  ;;  %v1103_v15 = vpop.f32.mrf.mxu0  ;;  %v63_v11 = vld [vmem:[%s5491_s3 + $0x8] sm:$0xff] }
 0x5cb   :  { %v1028_v16 = vadd.f32 %v1027_v14, %v5051_v4  ;;  %v1104_v17 = vadd.f32 %v1103_v15, %v5051_v4  ;;  %v65_v14 = vld [vmem:[%s5491_s3 + $0x18] sm:$0xff] }
 0x5cc   :  { %v4427_v18 = vpop.f32.mrf.mxu1  ;;  %v4432_v53 = vpop.f32.mrf.mxu0 }
 0x5cd   :  { %v1186_v19 = vsel %vm224_vm2, %v1028_v16, -inf  ;;  %v1189_v20 = vsel %vm224_vm2, %v1104_v17, -inf }
 0x5ce   :  { %1187 = vmax.xlane.f32.xlu1 %v1186_v19  ;;  %v1179_v21 = vpop.f32.mrf.mxu1  ;;  %1190 = vmax.xlane.f32.xlu0 %v1189_v20 }
 0x5cf   :  { %v1180_v22 = vadd.f32 %v1179_v21, %v5051_v4 }
 0x5d0   :  { %v4437_v23 = vpop.f32.mrf.mxu1 }
 0x5d1   :  { %v1192_v24 = vsel %vm224_vm2, %v1180_v22, -inf }
 0x5d2   :  { %1193 = vmax.xlane.f32.xlu0 %v1192_v24 }
 0x653   :  { %v1185_v29 = vpop.xlane.xlu0 %1184 }
 0x654   :  { %v1195_v31 = vsub.f32 %v952_v8, %v1185_v29 }
 0x656   :  { %v1199_v32 = vmul.f32 1.442695, %v1195_v31 }
 0x657   :  { %v1188_v33 = vpop.xlane.xlu1 %1187  ;;  %v1191_v34 = vpop.xlane.xlu0 %1190 }
 0x658   :  { %4681 = vpow2.f32 %v1199_v32  ;;  %v1196_v35 = vsub.f32 %v1028_v16, %v1188_v33  ;;  %v1197_v36 = vsub.f32 %v1104_v17, %v1191_v34 }
 0x65a   :  { %v1201_v37 = vmul.f32 1.442695, %v1196_v35  ;;  %v1203_v38 = vmul.f32 1.442695, %v1197_v36  ;;  %v1873_v36 = vsub.s32 3, %v4895_v25 }
 0x65b   :  { %v1194_v48 = vpop.xlane.xlu0 %1193 }
 0x65c   :  { %4683 = vpow2.f32 %v1201_v37  ;;  %v1198_v49 = vsub.f32 %v1180_v22, %v1194_v48  ;;  %v1874_v48 = vrot.slane %v4900_v27, %v1873_v36 }
 0x65d   :  { %4685 = vpow2.f32 %v1203_v38 }
 0x65e   :  { %v1205_v50 = vmul.f32 1.442695, %v1198_v49 }
 0x660   :  { %4687 = vpow2.f32 %v1205_v50 }
 0x665   :  { %v4682_v40 = vpop.eup %4681 }
 0x666   :  { %v1207_v42 = vsel %vm224_vm2, %v4682_v40, 0.0 }
 0x667   :  { %1208 = vadd.xlane.f32.xlu0 %v1207_v42 }
 0x669   :  { %v4684_v44 = vpop.eup %4683 }
 0x66a   :  { %v4686_v45 = vpop.eup %4685  ;;  %v1210_v46 = vsel %vm224_vm2, %v4684_v44, 0.0 }
 0x66b   :  { %1211 = vadd.xlane.f32.xlu1 %v1210_v46  ;;  %v1213_v47 = vsel %vm224_vm2, %v4686_v45, 0.0 }
 0x66c   :  { %1214 = vadd.xlane.f32.xlu0 %v1213_v47 }
 0x66d   :  { %v4688_v51 = vpop.eup %4687 }
 0x66e   :  { %v1216_v52 = vsel %vm224_vm2, %v4688_v51, 0.0 }
 0x67c   :  { %1303 = vrot.lane.b32.xlu1 %v4983_v12, %s4817_s25 }
 0x680   :  { %1379 = vrot.lane.b32.xlu1 %v4993_v30, %s4817_s25 }
 0x682   :  { %1227 = vrot.lane.b32.xlu0 %v4917_v43, %s4817_s25 }
 0x6a4   :  { %1217 = vadd.xlane.f32.xlu1 %v1216_v52 }
 0x6b5   :  { %1455 = vrot.lane.b32.xlu1 %v4987_v13, %s4817_s25  ;;  %v62_v13 = vld [vmem:[%s5491_s3] sm:$0xff] }
 0x6f0   :  { %v1209_v55 = vpop.xlane.xlu0 %1208 }
 0x6f1   :  { %4689 = vrcp.f32 %v1209_v55 }
 0x6f4   :  { %v1212_v12 = vpop.xlane.xlu1 %1211 }
 0x6f5   :  { %4691 = vrcp.f32 %v1212_v12  ;;  %v1215_v56 = vpop.xlane.xlu0 %1214 }
 0x6f6   :  { %4693 = vrcp.f32 %v1215_v56 }
 0x6f8   :  { %v1304_v30 = vpop.permute.xlu1 %1303 }
 0x6f9   :  { %v1228_v57 = vpop.permute.xlu0 %1227  ;;  %4444 = vmatpush3.msra.mxu1 %v1304_v30 }
 0x6fa   :  { %4439 = vmatpush3.msra.mxu0 %v1228_v57  ;;  %4453 = vmatprep.subr.mxu1 %v4811_v41 }
 0x6fb   :  { %4448 = vmatprep.subr.mxu0 %v4811_v41 }
 0x6fc   :  { %v1380_v59 = vpop.permute.xlu1 %1379 }
 0x6fe   :  { %v4690_v43 = vpop.eup %4689 }
 0x6ff   :  { %v1220_v58 = vmul.f32 %v4690_v43, %v4682_v40 }
 0x701   :  { %4441 = vmatmul.mubr.msk.f32.vlgmr.msra.gmra.mxu0 %vm224_vm2, %v1220_v58 }
 0x702   :  { %v4692_v60 = vpop.eup %4691  ;;  %4449 = vmatpush3.msra.mxu0 %v1380_v59  ;;  %4450 = vmatprep.mubr.msk.f32.mxu0 %vm4812_vm1, %v4811_v41 }
 0x703   :  { %v4694_v62 = vpop.eup %4693  ;;  %v1222_v2 = vmul.f32 %v4692_v60, %v4684_v44  ;;  %4458 = vmatprep.subr.mxu0 %v62_v13 }
 0x704   :  { %v1224_v5 = vmul.f32 %v4694_v62, %v4686_v45 }
 0x705   :  { %4446 = vmatmul.mubr.msk.f32.vlgmr.msra.gmra.mxu1 %vm224_vm2, %v1222_v2 }
 0x706   :  { %4451 = vmatmul.mubr.msk.f32.vlgmr.msra.gmra.mxu0 %vm224_vm2, %v1224_v5  ;;  %4455 = vmatprep.mubr.msk.f32.mxu1 %vm4812_vm1, %v4811_v41  ;;  %v69_v5 = vld [vmem:[%s5492_s4 + $0x18] sm:$0xff] }
 0x707   :  { %4460 = vmatprep.mubr.msk.f32.mxu0 %vm224_vm2, %v5043_v61  ;;  %4459 = vmatpush3.msra.mxu0 %v62_v13  ;;  %v64_v61 = vld [vmem:[%s5491_s3 + $0x10] sm:$0xff] }
 0x708   :  { %4468 = vmatprep.subr.mxu0 %v64_v61 }
 0x72d   :  { %v1218_v7 = vpop.xlane.xlu1 %1217 }
 0x72e   :  { %4695 = vrcp.f32 %v1218_v7  ;;  %v68_v7 = vld [vmem:[%s5492_s4 + $0x10] sm:$0xff] }
 0x731   :  { %v1456_v8 = vpop.permute.xlu1 %1455 }
 0x732   :  { %4454 = vmatpush3.msra.mxu1 %v1456_v8  ;;  %v67_v8 = vld [vmem:[%s5492_s4 + $0x8] sm:$0xff] }
 0x733   :  { %4463 = vmatprep.subr.mxu1 %v63_v11 }
 0x73b   :  { %v4696_v9 = vpop.eup %4695 }
 0x73c   :  { %v1226_v10 = vmul.f32 %v4696_v9, %v4688_v51  ;;  %v66_v9 = vld [vmem:[%s5492_s4] sm:$0xff] }
 0x73e   :  { %4456 = vmatmul.mubr.msk.f32.vlgmr.msra.gmra.mxu1 %vm224_vm2, %v1226_v10  ;;  %v77_v10 = vld [vmem:[%s5493_s5 + $0x38] sm:$0xff] }
 0x73f   :  { %4465 = vmatprep.mubr.msk.f32.mxu1 %vm224_vm2, %v5045_v63  ;;  %4464 = vmatpush3.msra.mxu1 %v63_v11  ;;  %v76_v11 = vld [vmem:[%s5493_s5 + $0x30] sm:$0xff] }
 0x740   :  { %4473 = vmatprep.subr.mxu1 %v65_v14 }
 0x7c1   :  { %v1299_v15 = vpop.f32.mrf.mxu0 }
 0x7c2   :  { %4461 = vmatmul.mubr.msk.f32.vlgmr.msra.gmra.mxu0 %vm224_vm2, %v1299_v15 }
 0x7c3   :  { %v4442_v63 = vpop.f32.mrf.mxu0  ;;  %4470 = vmatprep.mubr.msk.f32.mxu0 %vm224_vm2, %v5047_v3  ;;  %4469 = vmatpush3.msra.mxu0 %v64_v61  ;;  %v75_v61 = vld [vmem:[%s5493_s5 + $0x28] sm:$0xff] }
 0x7c4   :  { %4478 = vmatprep.subr.mxu0 %v69_v5 }
 0x7c5   :  { %v1375_v16 = vpop.f32.mrf.mxu1 }
 0x7c6   :  { %v1451_v17 = vpop.f32.mrf.mxu0  ;;  %4466 = vmatmul.mubr.msk.f32.vlgmr.msra.gmra.mxu1 %vm224_vm2, %v1375_v16 }
 0x7c7   :  { %4471 = vmatmul.mubr.msk.f32.vlgmr.msra.gmra.mxu0 %vm224_vm2, %v1451_v17  ;;  %v4447_v18 = vpop.f32.mrf.mxu1  ;;  %4475 = vmatprep.mubr.msk.f32.mxu1 %vm224_vm2, %v5053_v6 }
 0x7c8   :  { %v4452_v53 = vpop.f32.mrf.mxu0  ;;  %4474 = vmatpush3.msra.mxu1 %v65_v14  ;;  %4479 = vmatpush3.msra.mxu0 %v69_v5  ;;  %v74_v14 = vld [vmem:[%s5493_s5 + $0x20] sm:$0xff] }
 0x7c9   :  { %4480 = vmatprep.subr.mxu0 %v68_v7  ;;  %4489 = vmatprep.subr.mxu1 %v77_v10 }
 0x7ca   :  { %4481 = vmatpush3.msra.mxu0 %v68_v7 }
 0x7cb   :  { %4482 = vmatprep.subr.mxu0 %v67_v8 }
 0x7cc   :  { %4483 = vmatpush3.msra.mxu0 %v67_v8  ;;  %v4180_v8 = vld [vmem:[%s5490_s2 + $0x38] sm:$0xff] }
 0x7cd   :  { %4484 = vmatprep.subr.mxu0 %v66_v9 }
 0x7ce   :  { %4485 = vmatpush3.msra.mxu0 %v66_v9  ;;  %v4179_v9 = vld [vmem:[%s5490_s2 + $0x30] sm:$0xff] }
 0x7cf   :  { %4508 = vmatprep.subr.mxu0 %v4180_v8 }
 0x7fe   :  { %v1527_v19 = vpop.f32.mrf.mxu1 }
 0x7ff   :  { %4476 = vmatmul.mubr.msk.f32.vlgmr.msra.gmra.mxu1 %vm224_vm2, %v1527_v19  ;;  %v1905_v19 = vsub.s32 4, %v4895_v25 }
 0x800   :  { %v4457_v20 = vpop.f32.mrf.mxu1  ;;  %4490 = vmatpush3.msra.mxu1 %v77_v10  ;;  %v4178_v10 = vld [vmem:[%s5490_s2 + $0x28] sm:$0xff] }
 0x801   :  { %4491 = vmatprep.subr.mxu1 %v76_v11  ;;  %v1911_v20 = vsub.s32 5, %v4895_v25 }
 0x802   :  { %4492 = vmatpush3.msra.mxu1 %v76_v11  ;;  %v4177_v11 = vld [vmem:[%s5490_s2 + $0x20] sm:$0xff] }
 0x803   :  { %4493 = vmatprep.subr.mxu1 %v75_v61 }
 0x804   :  { %4494 = vmatpush3.msra.mxu1 %v75_v61 }
 0x805   :  { %4495 = vmatprep.subr.mxu1 %v74_v14 }
 0x806   :  { %4496 = vmatpush3.msra.mxu1 %v74_v14 }
 0x882   :  { %v4462_v21 = vpop.f32.mrf.mxu0 }
 0x883   :  { %v1862_v31 = vsel %vm79_vm0, %v4462_v21, 0.0  ;;  %v1906_v21 = vrot.slane %v4900_v27, %v1905_v19 }
 0x884   :  { %v1603_v3 = vpop.f32.mrf.mxu0 }
 0x885   :  { %v1855_v6 = vsel %vm79_vm0, %v1603_v3, 0.0 }
 0x886   :  { %v4467_v22 = vpop.f32.mrf.mxu1 }
 0x887   :  { %v1863_v24 = vsel %vm79_vm0, %v4467_v22, 0.0  ;;  %v4472_v29 = vpop.f32.mrf.mxu0 }
 0x888   :  { %v1684_v23 = vpop.f32.mrf.mxu1  ;;  %v1864_v33 = vadd.f32 %v1863_v24, %v1862_v31  ;;  %v1865_v37 = vsel %vm79_vm0, %v4472_v29, 0.0 }
 0x889   :  { %v1856_v32 = vsel %vm79_vm0, %v1684_v23, 0.0  ;;  %v1765_v35 = vpop.f32.mrf.mxu0  ;;  %v1912_v23 = vrot.slane %v4900_v27, %v1911_v20 }
 0x88a   :  { %v1857_v34 = vadd.f32 %v1856_v32, %v1855_v6  ;;  %v1866_v38 = vadd.f32 %v1865_v37, %v1864_v33  ;;  %v1858_v42 = vsel %vm79_vm0, %v1765_v35, 0.0  ;;  %v72_v35 = vld [vmem:[%s5493_s5 + $0x10] sm:$0xff]  ;;  %v71_v37 = vld [vmem:[%s5493_s5 + $0x8] sm:$0xff] }
 0x88c   :  { %v1859_v45 = vadd.f32 %v1858_v42, %v1857_v34  ;;  %v73_v34 = vld [vmem:[%s5493_s5 + $0x18] sm:$0xff] }
 0x88d   :  { %4497 = vmatprep.subr.mxu1 %v73_v34 }
 0x88e   :  { %4498 = vmatpush3.msra.mxu1 %v73_v34 }
 0x88f   :  { %4499 = vmatprep.subr.mxu1 %v72_v35 }
 0x890   :  { %4500 = vmatpush3.msra.mxu1 %v72_v35 }
 0x891   :  { %4501 = vmatprep.subr.mxu1 %v71_v37 }
 0x892   :  { %4502 = vmatpush3.msra.mxu1 %v71_v37 }
 0x8bf   :  { %v4477_v40 = vpop.f32.mrf.mxu1 }
 0x8c0   :  { %v1867_v44 = vsel %vm79_vm0, %v4477_v40, 0.0  ;;  %v1917_v40 = vsub.s32 6, %v4895_v25 }
 0x8c1   :  { %v1868_v46 = vadd.f32 %v1867_v44, %v1866_v38  ;;  %v1846_v47 = vpop.f32.mrf.mxu1  ;;  %v70_v38 = vld [vmem:[%s5493_s5] sm:$0xff] }
 0x8c2   :  { %v1860_v49 = vsel %vm79_vm0, %v1846_v47, 0.0  ;;  %4503 = vmatprep.subr.mxu1 %v70_v38  ;;  %v1918_v42 = vrot.slane %v4900_v27, %v1917_v40 }
 0x8c3   :  { %v1870_v50 = vadd.f32 %v1868_v46, %v4873_v1  ;;  %v1861_v51 = vadd.f32 %v1860_v49, %v1859_v45  ;;  %4504 = vmatpush3.msra.mxu1 %v70_v38 }
 0x8c4   :  { %4524 = vmatprep.subr.mxu1 %v4811_v41 }
 0x8c5   :  { %v1869_v52 = vadd.f32 %v1861_v51, %v4871_v0  ;;  %v5123_v55 = vadd.f32 %v1874_v48, %v1870_v50  ;;  %v2088_v50 = vsub.s32 7, %v4895_v25 }
 0x8c7   :  { %v1880_v12 = vsel %vm79_vm0, %v5123_v55, 0.0  ;;  %v5127_v56 = vadd.f32 %v1874_v48, %v1869_v52  ;;  %v2089_v51 = vrot.slane %v4900_v27, %v2088_v50 }
 0x8c8   :  { %1881 = vadd.xlane.f32.xlu1 %v1880_v12 }
 0x8c9   :  { %v1877_v30 = vsel %vm79_vm0, %v5127_v56, 0.0 }
 0x8ca   :  { %1878 = vadd.xlane.f32.xlu0 %v1877_v30 }
 0x951   :  { %v1882_v57 = vpop.xlane.xlu1 %1881 }
 0x952   :  { %v1884_v43 = vmul.f32 0.03125, %v1882_v57 }
 0x953   :  { %v1879_v58 = vpop.xlane.xlu0 %1878 }
 0x954   :  { %v1883_v13 = vmul.f32 0.03125, %v1879_v58  ;;  %v1886_v1 = vsub.f32 %v5123_v55, %v1884_v43 }
 0x956   :  { %v1885_v0 = vsub.f32 %v5127_v56, %v1883_v13  ;;  %v1888_v62 = vmul.f32 %v1886_v1, %v1886_v1 }
 0x958   :  { %v1887_v59 = vmul.f32 %v1885_v0, %v1885_v0  ;;  %v1892_v2 = vsel %vm79_vm0, %v1888_v62, 0.0 }
 0x95a   :  { %v1889_v60 = vsel %vm79_vm0, %v1887_v59, 0.0 }
 0x95b   :  { %1890 = vadd.xlane.f32.xlu0 %v1889_v60 }
 0x95f   :  { %1893 = vadd.xlane.f32.xlu0 %v1892_v2 }
 0x9e4   :  { %v1891_v15 = vpop.xlane.xlu0 %1890 }
 0x9e5   :  { %v1895_v63 = vmul.f32 0.03125, %v1891_v15 }
 0x9e7   :  { %v1897_v16 = vadd.f32 1e-06, %v1895_v63 }
 0x9e8   :  { %v1894_v17 = vpop.xlane.xlu0 %1893 }
 0x9e9   :  { %4697 = vrsqrt.f32 %v1897_v16  ;;  %v1896_v18 = vmul.f32 0.03125, %v1894_v17 }
 0x9eb   :  { %v1898_v53 = vadd.f32 1e-06, %v1896_v18  ;;  %v5221_v18 = vld [vmem:[#allocation5 + $0x8] sm:$0xff] }
 0x9ed   :  { %4699 = vrsqrt.f32 %v1898_v53 }
 0x9f6   :  { %v4698_v22 = vpop.eup %4697 }
 0x9f7   :  { %v1901_v3 = vmul.f32 %v4698_v22, %v1885_v0 }
 0x9f9   :  { %v1907_v24 = vmul.f32 %v1906_v21, %v1901_v3 }
 0x9fa   :  { %v4700_v29 = vpop.eup %4699 }
 0x9fb   :  { %v1902_v31 = vmul.f32 %v4700_v29, %v1886_v1  ;;  %v1913_v32 = vadd.f32 %v1912_v23, %v1907_v24  ;;  %v2153_v29 = vrot.slane %v5221_v18, %v4903_v28 }
 0x9fd   :  { %v1908_v33 = vmul.f32 %v1906_v21, %v1902_v31  ;;  %4486 = vmatprep.mubr.msk.f32.mxu0 %vm79_vm0, %v1913_v32  ;;  %v2147_v21 = vrot.slane %v5221_v18, %v4898_v26  ;;  %v2159_v26 = vrot.slane %v5221_v18, %v121_v39 }
 0x9ff   :  { %v1914_v6 = vadd.f32 %v1912_v23, %v1908_v33 }
 0xa01   :  { %4487 = vmatmul.mubr.msk.f32.vlgmr.msra.gmra.mxu0 %vm79_vm0, %v1914_v6 }
 0xa02   :  { %4509 = vmatpush3.msra.mxu0 %v4180_v8 }
 0xa03   :  { %4510 = vmatprep.subr.mxu0 %v4179_v9 }
 0xa04   :  { %4511 = vmatpush3.msra.mxu0 %v4179_v9 }
 0xa05   :  { %4512 = vmatprep.subr.mxu0 %v4178_v10 }
 0xa06   :  { %4513 = vmatpush3.msra.mxu0 %v4178_v10 }
 0xa07   :  { %4514 = vmatprep.subr.mxu0 %v4177_v11 }
 0xa08   :  { %4515 = vmatpush3.msra.mxu0 %v4177_v11 }
 0xa09   :  { %4519 = vmatprep.subr.mxu0 %v4811_v41 }
 0xac1   :  { %v4488_v44 = vpop.f32.mrf.mxu0 }
 0xac2   :  { %v1997_v45 = vadd.f32 %v4488_v44, %v1918_v42 }
 0xac3   :  { %v1991_v46 = vpop.f32.mrf.mxu0 }
 0xac4   :  { %v1992_v47 = vadd.f32 %v1991_v46, %v1918_v42  ;;  %v2001_v49 = vmax.f32 %v1997_v45, 0.0 }
 0xac6   :  { %v2000_v48 = vmax.f32 %v1992_v47, 0.0 }
 0xac8   :  { %4505 = vmatprep.mubr.msk.f32.mxu1 %vm2002_vm3, %v2000_v48 }
 0xac9   :  { %4506 = vmatmul.mubr.msk.f32.vlgmr.msra.gmra.mxu1 %vm2002_vm3, %v2001_v49 }
 0xaca   :  { %4526 = vmatprep.mubr.msk.f32.mxu1 %vm4812_vm1, %v4811_v41 }
 0xb89   :  { %v4507_v52 = vpop.f32.mrf.mxu1 }
 0xb8a   :  { %v2085_v12 = vadd.f32 %v4507_v52, %v5123_v55 }
 0xb8b   :  { %v2075_v30 = vpop.f32.mrf.mxu1 }
 0xb8c   :  { %v5195_v57 = vadd.f32 %v2089_v51, %v2085_v12  ;;  %v2084_v43 = vadd.f32 %v2075_v30, %v5127_v56 }
 0xb8e   :  { %v5198_v58 = vadd.f32 %v2089_v51, %v2084_v43  ;;  %v2121_v13 = vsel %vm79_vm0, %v5195_v57, 0.0 }
 0xb8f   :  { %2122 = vadd.xlane.f32.xlu1 %v2121_v13 }
 0xb90   :  { %v2118_v1 = vsel %vm79_vm0, %v5198_v58, 0.0 }
 0xb91   :  { %2119 = vadd.xlane.f32.xlu0 %v2118_v1 }
 0xc18   :  { %v2123_v0 = vpop.xlane.xlu1 %2122 }
 0xc19   :  { %v2125_v27 = vmul.f32 0.03125, %v2123_v0 }
 0xc1a   :  { %v2120_v59 = vpop.xlane.xlu0 %2119 }
 0xc1b   :  { %v2127_v55 = vsub.f32 %v5195_v57, %v2125_v27  ;;  %v2124_v60 = vmul.f32 0.03125, %v2120_v59 }
 0xc1d   :  { %v2126_v62 = vsub.f32 %v5198_v58, %v2124_v60  ;;  %v2129_v2 = vmul.f32 %v2127_v55, %v2127_v55 }
 0xc1f   :  { %v2133_v56 = vsel %vm79_vm0, %v2129_v2, 0.0  ;;  %v2128_v5 = vmul.f32 %v2126_v62, %v2126_v62 }
 0xc20   :  { %2134 = vadd.xlane.f32.xlu1 %v2133_v56 }
 0xc21   :  { %v2130_v7 = vsel %vm79_vm0, %v2128_v5, 0.0 }
 0xc22   :  { %2131 = vadd.xlane.f32.xlu0 %v2130_v7 }
 0xca9   :  { %v2135_v61 = vpop.xlane.xlu1 %2134 }
 0xcaa   :  { %v2137_v14 = vmul.f32 0.03125, %v2135_v61 }
 0xcab   :  { %v2132_v15 = vpop.xlane.xlu0 %2131 }
 0xcac   :  { %v2139_v63 = vadd.f32 1e-06, %v2137_v14  ;;  %v2136_v16 = vmul.f32 0.03125, %v2132_v15 }
 0xcae   :  { %4701 = vrsqrt.f32 %v2139_v63  ;;  %v2138_v17 = vadd.f32 1e-06, %v2136_v16 }
 0xcb0   :  { %4703 = vrsqrt.f32 %v2138_v17 }
 0xcbb   :  { %v4702_v53 = vpop.eup %4701 }
 0xcbc   :  { %v2143_v22 = vmul.f32 %v4702_v53, %v2127_v55 }
 0xcbd   :  { %v4704_v3 = vpop.eup %4703 }
 0xcbe   :  { %v2142_v23 = vmul.f32 %v4704_v3, %v2126_v62  ;;  %v2149_v24 = vmul.f32 %v2147_v21, %v2143_v22 }
 0xcc0   :  { %v2148_v31 = vmul.f32 %v2147_v21, %v2142_v23  ;;  %v2155_v33 = vadd.f32 %v2153_v29, %v2149_v24 }
 0xcc2   :  { %v2154_v32 = vadd.f32 %v2153_v29, %v2148_v31 }
 0xcc4   :  { %4516 = vmatprep.mubr.msk.f32.mxu0 %vm79_vm0, %v2154_v32 }
 0xcc5   :  { %4517 = vmatmul.mubr.msk.f32.vlgmr.msra.gmra.mxu0 %vm79_vm0, %v2155_v33 }
 0xcc6   :  { %4521 = vmatprep.mubr.msk.f32.mxu0 %vm4812_vm1, %v4811_v41 }
 0xd85   :  { %v4518_v6 = vpop.f32.mrf.mxu0 }
 0xd86   :  { %v5234_v34 = vadd.f32 %v4518_v6, %v2159_v26 }
 0xd87   :  { %v2232_v35 = vpop.f32.mrf.mxu0 }
 0xd88   :  { %v2233_v37 = vadd.f32 %v2232_v35, %v2159_v26 }
 0xd8a   :  { %2247 = vrot.lane.b32.xlu1 %v2233_v37, %s4813_s19  ;;  %2243 = vrot.lane.b32.xlu0 %v2233_v37, %s4814_s20 }
 0xd8e   :  { %2251 = vrot.lane.b32.xlu1 %v2233_v37, %s4815_s21 }
 0xd92   :  { %2255 = vrot.lane.b32.xlu1 %v2233_v37, %s4816_s22 }
 0xdfc   :  { %v2248_v28 = vpop.permute.xlu1 %2247  ;;  %v2244_v38 = vpop.permute.xlu0 %2243 }
 0xdfd   :  { %2407 = vrot.lane.b32.xlu1 %v2248_v28, %s4816_s22  ;;  %2331 = vrot.lane.b32.xlu0 %v2244_v38, %s4816_s22 }
 0xe00   :  { %v2252_v39 = vpop.permute.xlu1 %2251 }
 0xe01   :  { %2483 = vrot.lane.b32.xlu0 %v2252_v39, %s4816_s22 }
 0xe04   :  { %v2256_v42 = vpop.permute.xlu1 %2255 }
 0xe05   :  { %4520 = vmatpush3.xpose.msk.msra.mxu0 %vm224_vm2, %v2256_v42 }
 0xe06   :  { %4529 = vmatprep.subr.mxu0 %v4811_v41 }
 0xe08   :  { %4522 = vmatmul.mubr.msk.f32.vlgmr.msra.gmra.mxu0 %vm224_vm2, %v2233_v37 }
 0xe09   :  { %4531 = vmatprep.mubr.msk.f32.mxu0 %vm4812_vm1, %v4811_v41 }
 0xe6f   :  { %v2408_v44 = vpop.permute.xlu1 %2407  ;;  %v2332_v45 = vpop.permute.xlu0 %2331 }
 0xe70   :  { %4525 = vmatpush3.xpose.msk.msra.mxu1 %vm224_vm2, %v2332_v45  ;;  %4530 = vmatpush3.xpose.msk.msra.mxu0 %vm224_vm2, %v2408_v44 }
 0xe71   :  { %4534 = vmatprep.subr.mxu1 %v4811_v41  ;;  %4539 = vmatprep.subr.mxu0 %v4811_v41 }
 0xe73   :  { %4527 = vmatmul.mubr.msk.f32.vlgmr.msra.gmra.mxu1 %vm224_vm2, %v2244_v38  ;;  %4532 = vmatmul.mubr.msk.f32.vlgmr.msra.gmra.mxu0 %vm224_vm2, %v2248_v28  ;;  %v2484_v46 = vpop.permute.xlu0 %2483 }
 0xe74   :  { %4535 = vmatpush3.xpose.msk.msra.mxu1 %vm224_vm2, %v2484_v46  ;;  %4536 = vmatprep.mubr.msk.f32.mxu1 %vm4812_vm1, %v4811_v41 }
 0xe75   :  { %4544 = vmatprep.subr.mxu1 %v4811_v41  ;;  %4541 = vmatprep.mubr.msk.f32.mxu0 %vm4812_vm1, %v4811_v41 }
 0xe77   :  { %4537 = vmatmul.mubr.msk.f32.vlgmr.msra.gmra.mxu1 %vm224_vm2, %v2252_v39 }
 0xe78   :  { %4546 = vmatprep.mubr.msk.f32.mxu1 %vm4812_vm1, %v4811_v41 }
 0xec8   :  { %v2327_v47 = vpop.f32.mrf.mxu0 }
 0xec9   :  { %v2328_v48 = vadd.f32 %v2327_v47, %v4964_v54 }
 0xeca   :  { %v4523_v49 = vpop.f32.mrf.mxu0 }
 0xecb   :  { %v2559_v51 = vsel %vm224_vm2, %v2328_v48, -inf }
 0xecc   :  { %2560 = vmax.xlane.f32.xlu1 %v2559_v51 }
 0xedd   :  { %2245 = vrot.lane.b32.xlu1 %v5234_v34, %s4814_s20 }
 0xee1   :  { %2253 = vrot.lane.b32.xlu1 %v5234_v34, %s4815_s21 }
 0xee5   :  { %2679 = vrot.lane.b32.xlu1 %v2244_v38, %s4817_s25 }
 0xee9   :  { %2755 = vrot.lane.b32.xlu1 %v2248_v28, %s4817_s25 }
 0xeed   :  { %2831 = vrot.lane.b32.xlu1 %v2252_v39, %s4817_s25 }
 0xf33   :  { %v2403_v52 = vpop.f32.mrf.mxu1  ;;  %v2479_v12 = vpop.f32.mrf.mxu0 }
 0xf34   :  { %v2404_v30 = vadd.f32 %v2403_v52, %v4964_v54  ;;  %v2480_v1 = vadd.f32 %v2479_v12, %v4964_v54 }
 0xf35   :  { %v4528_v43 = vpop.f32.mrf.mxu1  ;;  %v4533_v13 = vpop.f32.mrf.mxu0 }
 0xf36   :  { %v2562_v0 = vsel %vm224_vm2, %v2404_v30, -inf  ;;  %v2565_v60 = vsel %vm224_vm2, %v2480_v1, -inf }
 0xf37   :  { %2563 = vmax.xlane.f32.xlu0 %v2562_v0  ;;  %v2555_v27 = vpop.f32.mrf.mxu1 }
 0xf38   :  { %v2556_v55 = vadd.f32 %v2555_v27, %v4964_v54 }
 0xf39   :  { %v4538_v59 = vpop.f32.mrf.mxu1 }
 0xf3a   :  { %v2568_v62 = vsel %vm224_vm2, %v2556_v55, -inf }
 0xf3b   :  { %2566 = vmax.xlane.f32.xlu0 %v2565_v60 }
 0xf3f   :  { %2569 = vmax.xlane.f32.xlu0 %v2568_v62 }
 0xf55   :  { %v2561_v2 = vpop.xlane.xlu1 %2560  ;;  %2249 = vrot.lane.b32.xlu0 %v5234_v34, %s4813_s19 }
 0xf56   :  { %v2571_v56 = vsub.f32 %v2328_v48, %v2561_v2 }
 0xf58   :  { %v2575_v5 = vmul.f32 1.442695, %v2571_v56 }
 0xf59   :  { %v5280_v7 = vpop.permute.xlu1 %2245  ;;  %2603 = vrot.lane.b32.xlu0 %v2233_v37, %s4817_s25 }
 0xf5a   :  { %4705 = vpow2.f32 %v2575_v5 }
 0xf5d   :  { %v5283_v8 = vpop.permute.xlu1 %2253 }
 0xf61   :  { %v2680_v54 = vpop.permute.xlu1 %2679 }
 0xf62   :  { %4545 = vmatpush3.msra.mxu1 %v2680_v54 }
 0xf63   :  { %4554 = vmatprep.subr.mxu1 %v4811_v41 }
 0xf65   :  { %v2756_v26 = vpop.permute.xlu1 %2755 }
 0xf67   :  { %v4706_v9 = vpop.eup %4705 }
 0xf68   :  { %v2583_v10 = vsel %vm224_vm2, %v4706_v9, 0.0 }
 0xf69   :  { %2584 = vadd.xlane.f32.xlu1 %v2583_v10  ;;  %v2832_v6 = vpop.permute.xlu1 %2831 }
 0xf7a   :  { %2983 = vrot.lane.b32.xlu1 %v5280_v7, %s4816_s22 }
 0xfc0   :  { %v2564_v11 = vpop.xlane.xlu0 %2563 }
 0xfc1   :  { %v2572_v61 = vsub.f32 %v2404_v30, %v2564_v11 }
 0xfc3   :  { %v2577_v14 = vmul.f32 1.442695, %v2572_v61 }
 0xfc4   :  { %v2567_v15 = vpop.xlane.xlu0 %2566 }
 0xfc5   :  { %4707 = vpow2.f32 %v2577_v14  ;;  %v2573_v63 = vsub.f32 %v2480_v1, %v2567_v15 }
 0xfc7   :  { %v2579_v16 = vmul.f32 1.442695, %v2573_v63 }
 0xfc8   :  { %v2570_v17 = vpop.xlane.xlu0 %2569 }
 0xfc9   :  { %4709 = vpow2.f32 %v2579_v16  ;;  %v2574_v53 = vsub.f32 %v2556_v55, %v2570_v17 }
 0xfcb   :  { %v2581_v21 = vmul.f32 1.442695, %v2574_v53 }
 0xfcc   :  { %v5289_v22 = vpop.permute.xlu0 %2249 }
 0xfcd   :  { %4711 = vpow2.f32 %v2581_v21 }
 0xfd0   :  { %v2604_v3 = vpop.permute.xlu0 %2603 }
 0xfd1   :  { %4540 = vmatpush3.msra.mxu0 %v2604_v3 }
 0xfd2   :  { %v4708_v23 = vpop.eup %4707  ;;  %4549 = vmatprep.subr.mxu0 %v4811_v41 }
 0xfd3   :  { %v2586_v24 = vsel %vm224_vm2, %v4708_v23, 0.0 }
 0xfd4   :  { %2587 = vadd.xlane.f32.xlu0 %v2586_v24 }
 0xfd6   :  { %v4710_v29 = vpop.eup %4709 }
 0xfd7   :  { %v2589_v31 = vsel %vm224_vm2, %v4710_v29, 0.0 }
 0xfd8   :  { %2590 = vadd.xlane.f32.xlu0 %v2589_v31 }
 0xfda   :  { %v4712_v32 = vpop.eup %4711 }
 0xfdb   :  { %v2592_v33 = vsel %vm224_vm2, %v4712_v32, 0.0 }
 0xfdc   :  { %2593 = vadd.xlane.f32.xlu1 %v2592_v33 }
 0xfed   :  { %3135 = vrot.lane.b32.xlu1 %v5283_v8, %s4816_s22 }
 0xfee   :  { %2907 = vrot.lane.b32.xlu0 %v5234_v34, %s4816_s22 }
 0xff2   :  { %v2585_v35 = vpop.xlane.xlu1 %2584  ;;  %3059 = vrot.lane.b32.xlu0 %v5289_v22, %s4816_s22 }
 0xff3   :  { %4713 = vrcp.f32 %v2585_v35 }
 0xff6   :  { %v2984_v39 = vpop.permute.xlu1 %2983 }
0x1000   :  { %v4714_v37 = vpop.eup %4713 }
0x1001   :  { %v2596_v28 = vmul.f32 %v4714_v37, %v4706_v9 }
0x1003   :  { %4542 = vmatmul.mubr.msk.f32.vlgmr.msra.gmra.mxu0 %vm224_vm2, %v2596_v28 }
0x1004   :  { %4550 = vmatpush3.msra.mxu0 %v2756_v26  ;;  %4551 = vmatprep.mubr.msk.f32.mxu0 %vm4812_vm1, %v4811_v41 }
0x1005   :  { %4559 = vmatprep.subr.mxu0 %v4811_v41 }
0x105d   :  { %v2588_v38 = vpop.xlane.xlu0 %2587 }
0x105e   :  { %4715 = vrcp.f32 %v2588_v38 }
0x1061   :  { %v2591_v42 = vpop.xlane.xlu0 %2590 }
0x1062   :  { %4717 = vrcp.f32 %v2591_v42 }
0x1065   :  { %v2594_v44 = vpop.xlane.xlu1 %2593  ;;  %v2908_v48 = vpop.permute.xlu0 %2907 }
0x1066   :  { %4719 = vrcp.f32 %v2594_v44 }
0x1069   :  { %v3060_v12 = vpop.permute.xlu0 %3059  ;;  %v3136_v30 = vpop.permute.xlu1 %3135 }
0x106b   :  { %v4716_v45 = vpop.eup %4715 }
0x106c   :  { %v2598_v46 = vmul.f32 %v4716_v45, %v4708_v23 }
0x106e   :  { %4547 = vmatmul.mubr.msk.f32.vlgmr.msra.gmra.mxu1 %vm224_vm2, %v2598_v46 }
0x106f   :  { %v4718_v47 = vpop.eup %4717  ;;  %4555 = vmatpush3.msra.mxu1 %v2832_v6  ;;  %4556 = vmatprep.mubr.msk.f32.mxu1 %vm4812_vm1, %v4811_v41 }
0x1070   :  { %v2600_v49 = vmul.f32 %v4718_v47, %v4710_v29  ;;  %4564 = vmatprep.subr.mxu1 %v4811_v41 }
0x1072   :  { %4552 = vmatmul.mubr.msk.f32.vlgmr.msra.gmra.mxu0 %vm224_vm2, %v2600_v49 }
0x1073   :  { %v4720_v51 = vpop.eup %4719  ;;  %4560 = vmatpush3.xpose.msk.msra.mxu0 %vm224_vm2, %v2908_v48  ;;  %4561 = vmatprep.mubr.msk.f32.mxu0 %vm4812_vm1, %v4811_v41 }
0x1074   :  { %4569 = vmatprep.subr.mxu0 %v4811_v41  ;;  %v2602_v52 = vmul.f32 %v4720_v51, %v4712_v32 }
0x1076   :  { %4557 = vmatmul.mubr.msk.f32.vlgmr.msra.gmra.mxu1 %vm224_vm2, %v2602_v52  ;;  %4562 = vmatmul.mubr.msk.f32.vlgmr.msra.gmra.mxu0 %vm224_vm2, %v5234_v34 }
0x1077   :  { %4565 = vmatpush3.xpose.msk.msra.mxu1 %vm224_vm2, %v2984_v39  ;;  %4570 = vmatpush3.xpose.msk.msra.mxu0 %vm224_vm2, %v3060_v12 }
0x1078   :  { %4566 = vmatprep.mubr.msk.f32.mxu1 %vm4812_vm1, %v4811_v41  ;;  %4571 = vmatprep.mubr.msk.f32.mxu0 %vm4812_vm1, %v4811_v41 }
0x1079   :  { %4574 = vmatprep.subr.mxu1 %v4811_v41  ;;  %4579 = vmatprep.subr.mxu0 %v4811_v41 }
0x107a   :  { %4567 = vmatmul.mubr.msk.f32.vlgmr.msra.gmra.mxu1 %vm224_vm2, %v5280_v7  ;;  %4572 = vmatmul.mubr.msk.f32.vlgmr.msra.gmra.mxu0 %vm224_vm2, %v5289_v22 }
0x107b   :  { %4575 = vmatpush3.xpose.msk.msra.mxu1 %vm224_vm2, %v3136_v30  ;;  %4576 = vmatprep.mubr.msk.f32.mxu1 %vm4812_vm1, %v4811_v41 }
0x107c   :  { %4584 = vmatprep.subr.mxu1 %v4811_v41  ;;  %4581 = vmatprep.mubr.msk.f32.mxu0 %vm4812_vm1, %v4811_v41 }
0x107e   :  { %4577 = vmatmul.mubr.msk.f32.vlgmr.msra.gmra.mxu1 %vm224_vm2, %v5283_v8 }
0x107f   :  { %4586 = vmatprep.mubr.msk.f32.mxu1 %vm4812_vm1, %v4811_v41 }
0x10c3   :  { %v5339_v43 = vpop.f32.mrf.mxu0 }
0x10c5   :  { %v4543_v13 = vpop.f32.mrf.mxu0 }
0x112e   :  { %v5341_v1 = vpop.f32.mrf.mxu1 }
0x1130   :  { %v4548_v0 = vpop.f32.mrf.mxu1 }
0x1132   :  { %v5343_v27 = vpop.f32.mrf.mxu0 }
0x1134   :  { %v4553_v59 = vpop.f32.mrf.mxu0 }
0x1136   :  { %v5345_v55 = vpop.f32.mrf.mxu1  ;;  %v2979_v60 = vpop.f32.mrf.mxu0 }
0x1137   :  { %v2980_v62 = vadd.f32 %v2979_v60, %v5051_v4 }
0x1138   :  { %v4558_v2 = vpop.f32.mrf.mxu1  ;;  %v4563_v56 = vpop.f32.mrf.mxu0 }
0x1139   :  { %v3211_v5 = vsel %vm224_vm2, %v2980_v62, -inf }
0x113a   :  { %v3055_v54 = vpop.f32.mrf.mxu1  ;;  %3212 = vmax.xlane.f32.xlu0 %v3211_v5  ;;  %v3131_v9 = vpop.f32.mrf.mxu0  ;;  %v4182_v5 = vld [vmem:[%s5491_s3 + $0x28] sm:$0xff] }
0x113b   :  { %v3056_v10 = vadd.f32 %v3055_v54, %v5051_v4  ;;  %v3132_v11 = vadd.f32 %v3131_v9, %v5051_v4 }
0x113c   :  { %v4568_v61 = vpop.f32.mrf.mxu1  ;;  %v4573_v14 = vpop.f32.mrf.mxu0 }
0x113d   :  { %v3214_v15 = vsel %vm224_vm2, %v3056_v10, -inf  ;;  %v3217_v63 = vsel %vm224_vm2, %v3132_v11, -inf }
0x113e   :  { %3215 = vmax.xlane.f32.xlu1 %v3214_v15  ;;  %v3207_v16 = vpop.f32.mrf.mxu1  ;;  %3218 = vmax.xlane.f32.xlu0 %v3217_v63 }
0x113f   :  { %v3208_v17 = vadd.f32 %v3207_v16, %v5051_v4 }
0x1140   :  { %v4578_v53 = vpop.f32.mrf.mxu1 }
0x1141   :  { %v3220_v21 = vsel %vm224_vm2, %v3208_v17, -inf }
0x1142   :  { %3221 = vmax.xlane.f32.xlu0 %v3220_v21 }
0x11c3   :  { %v3213_v3 = vpop.xlane.xlu0 %3212 }
0x11c4   :  { %v3223_v23 = vsub.f32 %v2980_v62, %v3213_v3 }
0x11c6   :  { %v3227_v24 = vmul.f32 1.442695, %v3223_v23 }
0x11c7   :  { %v3216_v29 = vpop.xlane.xlu1 %3215  ;;  %v3219_v31 = vpop.xlane.xlu0 %3218 }
0x11c8   :  { %4721 = vpow2.f32 %v3227_v24  ;;  %v3224_v32 = vsub.f32 %v3056_v10, %v3216_v29  ;;  %v3225_v33 = vsub.f32 %v3132_v11, %v3219_v31 }
0x11ca   :  { %v3229_v26 = vmul.f32 1.442695, %v3224_v32  ;;  %v3231_v6 = vmul.f32 1.442695, %v3225_v33 }
0x11cb   :  { %v3222_v42 = vpop.xlane.xlu0 %3221 }
0x11cc   :  { %4723 = vpow2.f32 %v3229_v26  ;;  %v3226_v44 = vsub.f32 %v3208_v17, %v3222_v42 }
0x11cd   :  { %4725 = vpow2.f32 %v3231_v6 }
0x11ce   :  { %v3233_v45 = vmul.f32 1.442695, %v3226_v44 }
0x11d0   :  { %4727 = vpow2.f32 %v3233_v45 }
0x11d5   :  { %v4722_v35 = vpop.eup %4721 }
0x11d6   :  { %v3235_v37 = vsel %vm224_vm2, %v4722_v35, 0.0 }
0x11d7   :  { %3236 = vadd.xlane.f32.xlu0 %v3235_v37 }
0x11d9   :  { %v4724_v4 = vpop.eup %4723 }
0x11da   :  { %v4726_v28 = vpop.eup %4725  ;;  %v3238_v38 = vsel %vm224_vm2, %v4724_v4, 0.0 }
0x11db   :  { %3239 = vadd.xlane.f32.xlu1 %v3238_v38  ;;  %v3241_v39 = vsel %vm224_vm2, %v4726_v28, 0.0  ;;  %v3902_v38 = vrot.slane %v5221_v18, %v1873_v36 }
0x11dc   :  { %3242 = vadd.xlane.f32.xlu0 %v3241_v39 }
0x11dd   :  { %v4728_v46 = vpop.eup %4727 }
0x11de   :  { %v3244_v47 = vsel %vm224_vm2, %v4728_v46, 0.0 }
0x11ec   :  { %3331 = vrot.lane.b32.xlu1 %v5280_v7, %s4817_s25 }
0x11f0   :  { %3407 = vrot.lane.b32.xlu1 %v5289_v22, %s4817_s25 }
0x11f2   :  { %3255 = vrot.lane.b32.xlu0 %v5234_v34, %s4817_s25 }
0x1214   :  { %3245 = vadd.xlane.f32.xlu1 %v3244_v47 }
0x1225   :  { %3483 = vrot.lane.b32.xlu1 %v5283_v8, %s4817_s25  ;;  %v4181_v8 = vld [vmem:[%s5491_s3 + $0x20] sm:$0xff] }
0x1260   :  { %v3237_v48 = vpop.xlane.xlu0 %3236 }
0x1261   :  { %4729 = vrcp.f32 %v3237_v48 }
0x1264   :  { %v3240_v7 = vpop.xlane.xlu1 %3239 }
0x1265   :  { %4731 = vrcp.f32 %v3240_v7  ;;  %v3243_v49 = vpop.xlane.xlu0 %3242 }
0x1266   :  { %4733 = vrcp.f32 %v3243_v49 }
0x1268   :  { %v3332_v22 = vpop.permute.xlu1 %3331 }
0x1269   :  { %v3256_v51 = vpop.permute.xlu0 %3255  ;;  %4585 = vmatpush3.msra.mxu1 %v3332_v22 }
0x126a   :  { %4580 = vmatpush3.msra.mxu0 %v3256_v51  ;;  %4594 = vmatprep.subr.mxu1 %v4811_v41 }
0x126b   :  { %4589 = vmatprep.subr.mxu0 %v4811_v41 }
0x126c   :  { %v3408_v12 = vpop.permute.xlu1 %3407 }
0x126e   :  { %v4730_v34 = vpop.eup %4729 }
0x126f   :  { %v3248_v52 = vmul.f32 %v4730_v34, %v4722_v35 }
0x1271   :  { %4582 = vmatmul.mubr.msk.f32.vlgmr.msra.gmra.mxu0 %vm224_vm2, %v3248_v52 }
0x1272   :  { %v4732_v30 = vpop.eup %4731  ;;  %4590 = vmatpush3.msra.mxu0 %v3408_v12  ;;  %4591 = vmatprep.mubr.msk.f32.mxu0 %vm4812_vm1, %v4811_v41 }
0x1273   :  { %v4734_v13 = vpop.eup %4733  ;;  %v3250_v0 = vmul.f32 %v4732_v30, %v4724_v4  ;;  %4599 = vmatprep.subr.mxu0 %v4181_v8  ;;  %v4188_v30 = vld [vmem:[%s5492_s4 + $0x38] sm:$0xff] }
0x1274   :  { %v3252_v59 = vmul.f32 %v4734_v13, %v4726_v28  ;;  %v4187_v13 = vld [vmem:[%s5492_s4 + $0x30] sm:$0xff] }
0x1275   :  { %4587 = vmatmul.mubr.msk.f32.vlgmr.msra.gmra.mxu1 %vm224_vm2, %v3250_v0  ;;  %v4186_v0 = vld [vmem:[%s5492_s4 + $0x28] sm:$0xff] }
0x1276   :  { %4592 = vmatmul.mubr.msk.f32.vlgmr.msra.gmra.mxu0 %vm224_vm2, %v3252_v59  ;;  %4596 = vmatprep.mubr.msk.f32.mxu1 %vm4812_vm1, %v4811_v41  ;;  %v4183_v41 = vld [vmem:[%s5491_s3 + $0x30] sm:$0xff]  ;;  %v4185_v59 = vld [vmem:[%s5492_s4 + $0x20] sm:$0xff] }
0x1277   :  { %4601 = vmatprep.mubr.msk.f32.mxu0 %vm224_vm2, %v5339_v43  ;;  %4600 = vmatpush3.msra.mxu0 %v4181_v8  ;;  %v4184_v43 = vld [vmem:[%s5491_s3 + $0x38] sm:$0xff] }
0x1278   :  { %4609 = vmatprep.subr.mxu0 %v4183_v41 }
0x129d   :  { %v3246_v60 = vpop.xlane.xlu1 %3245 }
0x129e   :  { %4735 = vrcp.f32 %v3246_v60  ;;  %v4196_v60 = vld [vmem:[%s5493_s5 + $0x78] sm:$0xff] }
0x12a1   :  { %v3484_v62 = vpop.permute.xlu1 %3483 }
0x12a2   :  { %4595 = vmatpush3.msra.mxu1 %v3484_v62  ;;  %v4195_v62 = vld [vmem:[%s5493_s5 + $0x70] sm:$0xff] }
0x12a3   :  { %4604 = vmatprep.subr.mxu1 %v4182_v5 }
0x12ab   :  { %v4736_v2 = vpop.eup %4735 }
0x12ac   :  { %v3254_v56 = vmul.f32 %v4736_v2, %v4728_v46  ;;  %v4194_v2 = vld [vmem:[%s5493_s5 + $0x68] sm:$0xff] }
0x12ae   :  { %4597 = vmatmul.mubr.msk.f32.vlgmr.msra.gmra.mxu1 %vm224_vm2, %v3254_v56  ;;  %v4193_v56 = vld [vmem:[%s5493_s5 + $0x60] sm:$0xff] }
0x12af   :  { %4606 = vmatprep.mubr.msk.f32.mxu1 %vm224_vm2, %v5341_v1  ;;  %4605 = vmatpush3.msra.mxu1 %v4182_v5 }
0x12b0   :  { %4614 = vmatprep.subr.mxu1 %v4184_v43 }
0x1331   :  { %v3327_v54 = vpop.f32.mrf.mxu0 }
0x1332   :  { %4602 = vmatmul.mubr.msk.f32.vlgmr.msra.gmra.mxu0 %vm224_vm2, %v3327_v54 }
0x1333   :  { %v4583_v1 = vpop.f32.mrf.mxu0  ;;  %4611 = vmatprep.mubr.msk.f32.mxu0 %vm224_vm2, %v5343_v27  ;;  %4610 = vmatpush3.msra.mxu0 %v4183_v41 }
0x1334   :  { %4619 = vmatprep.subr.mxu0 %v4188_v30 }
0x1335   :  { %v3403_v9 = vpop.f32.mrf.mxu1 }
0x1336   :  { %v3479_v10 = vpop.f32.mrf.mxu0  ;;  %4607 = vmatmul.mubr.msk.f32.vlgmr.msra.gmra.mxu1 %vm224_vm2, %v3403_v9 }
0x1337   :  { %4612 = vmatmul.mubr.msk.f32.vlgmr.msra.gmra.mxu0 %vm224_vm2, %v3479_v10  ;;  %v4588_v11 = vpop.f32.mrf.mxu1  ;;  %4616 = vmatprep.mubr.msk.f32.mxu1 %vm224_vm2, %v5345_v55  ;;  %v3934_v10 = vrot.slane %v5221_v18, %v1905_v19  ;;  %v4192_v19 = vld [vmem:[%s5493_s5 + $0x58] sm:$0xff] }
0x1338   :  { %v4593_v61 = vpop.f32.mrf.mxu0  ;;  %4615 = vmatpush3.msra.mxu1 %v4184_v43  ;;  %4620 = vmatpush3.msra.mxu0 %v4188_v30 }
0x1339   :  { %4621 = vmatprep.subr.mxu0 %v4187_v13  ;;  %4630 = vmatprep.subr.mxu1 %v4196_v60 }
0x133a   :  { %4622 = vmatpush3.msra.mxu0 %v4187_v13 }
0x133b   :  { %4623 = vmatprep.subr.mxu0 %v4186_v0 }
0x133c   :  { %4624 = vmatpush3.msra.mxu0 %v4186_v0 }
0x133d   :  { %4625 = vmatprep.subr.mxu0 %v4185_v59 }
0x133e   :  { %4626 = vmatpush3.msra.mxu0 %v4185_v59 }
0x136e   :  { %v3555_v14 = vpop.f32.mrf.mxu1 }
0x136f   :  { %4617 = vmatmul.mubr.msk.f32.vlgmr.msra.gmra.mxu1 %vm224_vm2, %v3555_v14  ;;  %v3940_v14 = vrot.slane %v5221_v18, %v1911_v20  ;;  %v4191_v20 = vld [vmem:[%s5493_s5 + $0x50] sm:$0xff] }
0x1370   :  { %v4598_v15 = vpop.f32.mrf.mxu1  ;;  %4631 = vmatpush3.msra.mxu1 %v4196_v60 }
0x1371   :  { %4632 = vmatprep.subr.mxu1 %v4195_v62 }
0x1372   :  { %4633 = vmatpush3.msra.mxu1 %v4195_v62 }
0x1373   :  { %4634 = vmatprep.subr.mxu1 %v4194_v2 }
0x1374   :  { %4635 = vmatpush3.msra.mxu1 %v4194_v2 }
0x1375   :  { %4636 = vmatprep.subr.mxu1 %v4193_v56 }
0x1376   :  { %4637 = vmatpush3.msra.mxu1 %v4193_v56 }
0x1377   :  { %4638 = vmatprep.subr.mxu1 %v4192_v19 }
0x1378   :  { %4639 = vmatpush3.msra.mxu1 %v4192_v19 }
0x1379   :  { %4640 = vmatprep.subr.mxu1 %v4191_v20 }
0x137a   :  { %4641 = vmatpush3.msra.mxu1 %v4191_v20 }
0x13f2   :  { %v4603_v63 = vpop.f32.mrf.mxu0 }
0x13f3   :  { %v3890_v3 = vsel %vm79_vm0, %v4603_v63, 0.0 }
0x13f4   :  { %v3631_v27 = vpop.f32.mrf.mxu0 }
0x13f5   :  { %v3883_v55 = vsel %vm79_vm0, %v3631_v27, 0.0 }
0x13f6   :  { %v4608_v16 = vpop.f32.mrf.mxu1 }
0x13f7   :  { %v3891_v53 = vsel %vm79_vm0, %v4608_v16, 0.0  ;;  %v4613_v21 = vpop.f32.mrf.mxu0 }
0x13f8   :  { %v3712_v17 = vpop.f32.mrf.mxu1  ;;  %v3892_v24 = vadd.f32 %v3891_v53, %v3890_v3  ;;  %v3893_v32 = vsel %vm79_vm0, %v4613_v21, 0.0  ;;  %v4190_v21 = vld [vmem:[%s5493_s5 + $0x48] sm:$0xff]  ;;  %v4189_v3 = vld [vmem:[%s5493_s5 + $0x40] sm:$0xff]  ;;  %s4818_s5 = smov [#allocation7]  }
0x13f9   :  { %v3884_v23 = vsel %vm79_vm0, %v3712_v17, 0.0  ;;  %v3793_v31 = vpop.f32.mrf.mxu0  ;;  %4642 = vmatprep.subr.mxu1 %v4190_v21  ;;  %s4126_s25 = sshll.u32 %s4818_s5, 4  ;;  %s4127_s25 = int_to_ptr.vmem [resolvable:$true] %s4126_s25 }
0x13fa   :  { %v3885_v29 = vadd.f32 %v3884_v23, %v3883_v55  ;;  %v3894_v33 = vadd.f32 %v3893_v32, %v3892_v24  ;;  %v3886_v6 = vsel %vm79_vm0, %v3793_v31, 0.0  ;;  %4643 = vmatpush3.msra.mxu1 %v4190_v21  ;;  %v3946_v23 = vrot.slane %v5221_v18, %v1917_v40  ;;  %s4781_s29 = scalar_lea.vmem %s4127_s25, 256  ;;  %p4786_p11 = scmp.lt.s32.totalorder %s4127_s25, %s4127_s25 }
0x13fb   :  { %4644 = vmatprep.subr.mxu1 %v4189_v3  ;;  %p4782_p10 = scmp.ne.s32.totalorder %s4127_s25, %s4781_s29  ;;  %p4787_p12 = scmp.lt.s32.totalorder %s4781_s29, %s4781_s29 }
0x13fc   :  { %v3887_v37 = vadd.f32 %v3886_v6, %v3885_v29  ;;  %4645 = vmatpush3.msra.mxu1 %v4189_v3 }
0x13fd   :  { %p4788_p13 = por %p4787_p12, %p4786_p11 }
0x13ff   :  { %p4789_p0 = pnand %p4788_p13, %p4782_p10 }
0x142f   :  { %v4618_v26 = vpop.f32.mrf.mxu1 }
0x1430   :  { %v3895_v35 = vsel %vm79_vm0, %v4618_v26, 0.0  ;;  %v4116_v26 = vrot.slane %v5221_v18, %v2088_v50 }
0x1431   :  { %v3896_v4 = vadd.f32 %v3895_v35, %v3894_v33  ;;  %v3874_v28 = vpop.f32.mrf.mxu1 }
0x1432   :  { %v3888_v39 = vsel %vm79_vm0, %v3874_v28, 0.0 }
0x1433   :  { %v3898_v42 = vadd.f32 %v3896_v4, %v5195_v57  ;;  %v3889_v44 = vadd.f32 %v3888_v39, %v3887_v37 }
0x1435   :  { %v3897_v45 = vadd.f32 %v3889_v44, %v5198_v58  ;;  %v5414_v46 = vadd.f32 %v3902_v38, %v3898_v42 }
0x1437   :  { %v3908_v47 = vsel %vm79_vm0, %v5414_v46, 0.0  ;;  %v5418_v48 = vadd.f32 %v3902_v38, %v3897_v45 }
0x1438   :  { %3909 = vadd.xlane.f32.xlu1 %v3908_v47 }
0x1439   :  { %v3905_v7 = vsel %vm79_vm0, %v5418_v48, 0.0 }
0x143a   :  { %3906 = vadd.xlane.f32.xlu0 %v3905_v7 }
0x14c1   :  { %v3910_v36 = vpop.xlane.xlu1 %3909 }
0x14c2   :  { %v3912_v49 = vmul.f32 0.03125, %v3910_v36 }
0x14c3   :  { %v3907_v22 = vpop.xlane.xlu0 %3906 }
0x14c4   :  { %v3911_v51 = vmul.f32 0.03125, %v3907_v22  ;;  %v3914_v57 = vsub.f32 %v5414_v46, %v3912_v49 }
0x14c6   :  { %v3913_v58 = vsub.f32 %v5418_v48, %v3911_v51  ;;  %v3916_v8 = vmul.f32 %v3914_v57, %v3914_v57 }
0x14c8   :  { %v3915_v34 = vmul.f32 %v3913_v58, %v3913_v58  ;;  %v3920_v12 = vsel %vm79_vm0, %v3916_v8, 0.0 }
0x14ca   :  { %v3917_v52 = vsel %vm79_vm0, %v3915_v34, 0.0 }
0x14cb   :  { %3918 = vadd.xlane.f32.xlu0 %v3917_v52 }
0x14cf   :  { %3921 = vadd.xlane.f32.xlu0 %v3920_v12 }
0x1554   :  { %v3919_v5 = vpop.xlane.xlu0 %3918 }
0x1555   :  { %v3923_v41 = vmul.f32 0.03125, %v3919_v5 }
0x1557   :  { %v3925_v43 = vadd.f32 1e-06, %v3923_v41 }
0x1558   :  { %v3922_v54 = vpop.xlane.xlu0 %3921 }
0x1559   :  { %4737 = vrsqrt.f32 %v3925_v43  ;;  %v3924_v1 = vmul.f32 0.03125, %v3922_v54 }
0x155b   :  { %v3926_v9 = vadd.f32 1e-06, %v3924_v1 }
0x155d   :  { %4739 = vrsqrt.f32 %v3926_v9 }
0x1566   :  { %v4738_v11 = vpop.eup %4737 }
0x1567   :  { %v3929_v61 = vmul.f32 %v4738_v11, %v3913_v58 }
0x1569   :  { %v3935_v15 = vmul.f32 %v3934_v10, %v3929_v61 }
0x156a   :  { %v4740_v63 = vpop.eup %4739 }
0x156b   :  { %v3930_v16 = vmul.f32 %v4740_v63, %v3914_v57  ;;  %v3941_v27 = vadd.f32 %v3940_v14, %v3935_v15 }
0x156d   :  { %v3936_v17 = vmul.f32 %v3934_v10, %v3930_v16  ;;  %4627 = vmatprep.mubr.msk.f32.mxu0 %vm79_vm0, %v3941_v27 }
0x156f   :  { %v3942_v53 = vadd.f32 %v3940_v14, %v3936_v17 }
0x1571   :  { %4628 = vmatmul.mubr.msk.f32.vlgmr.msra.gmra.mxu0 %vm79_vm0, %v3942_v53 }
0x1631   :  { %v4629_v24 = vpop.f32.mrf.mxu0 }
0x1632   :  { %v4025_v55 = vadd.f32 %v4629_v24, %v3946_v23 }
0x1633   :  { %v4019_v29 = vpop.f32.mrf.mxu0 }
0x1634   :  { %v4020_v31 = vadd.f32 %v4019_v29, %v3946_v23  ;;  %v4029_v33 = vmax.f32 %v4025_v55, 0.0 }
0x1636   :  { %v4028_v32 = vmax.f32 %v4020_v31, 0.0 }
0x1638   :  { %4646 = vmatprep.mubr.msk.f32.mxu1 %vm2002_vm3, %v4028_v32 }
0x1639   :  { %4647 = vmatmul.mubr.msk.f32.vlgmr.msra.gmra.mxu1 %vm2002_vm3, %v4029_v33 }
0x16f9   :  { %v4648_v6 = vpop.f32.mrf.mxu1 }
0x16fa   :  { %v4112_v35 = vadd.f32 %v4648_v6, %v5414_v46 }
0x16fb   :  { %v4102_v37 = vpop.f32.mrf.mxu1 }
0x16fc   :  { %v4118_v40 = vadd.f32 %v4116_v26, %v4112_v35  ;;  %v4111_v4 = vadd.f32 %v4102_v37, %v5418_v48 }
0x16fe   :  { %4120 = vst.msk [vmem:[#allocation7 + $0x8] sm:$0xff] %vm79_vm0, %v4118_v40  ;;  %v4117_v28 = vadd.f32 %v4116_v26, %v4111_v4 }
0x1700   :  { %4119 = vst.msk [vmem:[#allocation7] sm:$0xff] %vm79_vm0, %v4117_v28 }
0x1701   :  { %4792 = shalt.err (!%p4789_p0)
}
0x1702   :  { %4132 = dma.vmem_to_hbm [thread:$0]  %s4127_s25, 256, %s5495_s7, [#allocation4], %s4808_s27, %s4808_s27, %s4809_s28  }
0x1703   :  { %4805 = dma.done.wait [#allocation4], 256  }
0x1704   :  { %4806 = vsyncadd [#allocation4], 4294967040 }
0x1705   :  { %4136 = vsyncpa [#allocation3], 1 }
0x1706   :  { %4137 = vsyncpa [#allocation6], 1 }
0x1707   :  { %4138 = vsyncpa [#allocation4], 1 }

</bundles_post_ra>
